<compile_context>
chip_gen: v7x
topology: tpu7x:2x2x1
jax: 0.10.0
libtpu: 0.0.40
codegen_flags: <defaults>
</compile_context>

<pallas_src>
import functools
import math

import jax
import jax.numpy as jnp
from jax.experimental import pallas as pl
from jax.experimental.pallas import tpu as pltpu


def _layer_norm(v, g, b, eps=1e-5):
    mu = jnp.mean(v, axis=-1, keepdims=True)
    var = jnp.mean((v - mu) ** 2, axis=-1, keepdims=True)
    return (v - mu) * jax.lax.rsqrt(var + eps) * g + b


def _gelu_exact(x):
    # matches torch.nn.GELU() default (erf-based)
    return 0.5 * x * (1.0 + jax.lax.erf(x * (1.0 / math.sqrt(2.0))))


# ----------------------------- Kernel A: K/V projection -----------------------------

def kv_proj_kernel(x_ref, ln1g_ref, ln1b_ref, wk_ref, bk_ref, wv_ref, bv_ref,
                   k_ref, v_ref):
    bf16 = jnp.bfloat16
    x = x_ref[0]                                          # (TS, D) f32
    x1 = _layer_norm(x, ln1g_ref[0], ln1b_ref[0]).astype(bf16)
    k = jnp.dot(x1, wk_ref[...], preferred_element_type=jnp.float32) + bk_ref[0]
    v = jnp.dot(x1, wv_ref[...], preferred_element_type=jnp.float32) + bv_ref[0]
    k_ref[0] = k.astype(bf16)                             # lane-dense (TS, D) stores
    v_ref[0] = v.astype(bf16)


# -------------------------- Kernel B: attention + MLP block --------------------------

def attn_mlp_kernel(x_ref, k_ref, v_ref,
                    ln1g_ref, ln1b_ref,
                    wq_ref, bq_ref, wo_ref, bo_ref,
                    ln2g_ref, ln2b_ref,
                    w1_ref, b1_ref, w2_ref, b2_ref,
                    out_ref, o_stage, *, num_heads):
    bf16 = jnp.bfloat16
    D = x_ref.shape[-1]
    H = num_heads
    hd = D // H

    xt = x_ref[0]                                         # (TQ, D) f32 residual source
    x1 = _layer_norm(xt, ln1g_ref[0], ln1b_ref[0])
    # 1/sqrt(hd) already folded into wq / bq (prepare_params)
    q = jnp.dot(x1.astype(bf16), wq_ref[...],
                preferred_element_type=jnp.float32) + bq_ref[0]      # (TQ, D) f32
    qb = q.astype(bf16)

    # ---- multi-head attention: stage per-head outputs, single deep Wo matmul after ----
    for h in range(H):                                    # static, small H
        sl = slice(h * hd, (h + 1) * hd)
        kh = k_ref[0, :, sl]                              # (S, hd) bf16
        vh = v_ref[0, :, sl]                              # (S, hd) bf16
        # QK^T: contract last dims of both operands (no explicit transpose)
        s = jax.lax.dot_general(
            qb[:, sl], kh, (((1,), (1,)), ((), ())),
            preferred_element_type=jnp.float32)           # (TQ, S) f32
        s = s - jnp.max(s, axis=-1, keepdims=True)
        p = jnp.exp(s)                                    # unnormalized probabilities
        denom = jnp.sum(p, axis=-1, keepdims=True)        # (TQ, 1)
        o = jnp.dot(p.astype(bf16), vh,
                    preferred_element_type=jnp.float32)   # (TQ, hd) f32
        # deferred softmax normalization on the small (TQ, hd) tensor; recip on EUP slot
        o = o * pl.reciprocal(denom, approx=True)
        o_stage[:, sl] = o.astype(bf16)

    attn = jnp.dot(o_stage[...], wo_ref[...],
                   preferred_element_type=jnp.float32) + bo_ref[0]   # one deep K=D matmul

    # ---- residual 1 ----
    x2 = attn + xt

    # ---- LayerNorm 2 + MLP + residual 2 ----
    x3 = _layer_norm(x2, ln2g_ref[0], ln2b_ref[0])
    h1 = jnp.dot(x3.astype(bf16), w1_ref[...],
                 preferred_element_type=jnp.float32) + b1_ref[0]
    h1 = _gelu_exact(h1)
    h2 = jnp.dot(h1.astype(bf16), w2_ref[...],
                 preferred_element_type=jnp.float32) + b2_ref[0]

    out_ref[0] = (x2 + h2).astype(out_ref.dtype)          # one lane-dense (TQ, D) store


# ------------------------------------- wrapper --------------------------------------

def prepare_params(params, num_heads):
    """One-time weight prep (do NOT call per forward step): cast weights to bf16 and fold
    the 1/sqrt(head_dim) attention scale into wq / bq."""
    D = params["wq"].shape[0]
    assert D % num_heads == 0, "num_heads must divide input_dim"
    scale = 1.0 / math.sqrt(D // num_heads)
    bf16 = jnp.bfloat16
    return {
        "ln1_g": params["ln1_g"], "ln1_b": params["ln1_b"],
        "ln2_g": params["ln2_g"], "ln2_b": params["ln2_b"],
        "wq": (params["wq"] * scale).astype(bf16), "bq": params["bq"] * scale,
        "wk": params["wk"].astype(bf16), "bk": params["bk"],
        "wv": params["wv"].astype(bf16), "bv": params["bv"],
        "wo": params["wo"].astype(bf16), "bo": params["bo"],
        "w1": params["w1"].astype(bf16), "b1": params["b1"],
        "w2": params["w2"].astype(bf16), "b2": params["b2"],
    }


def _vmem_limit(resident_bytes):
    # resident set + generous margin for compiler temporaries; capped at 128 MiB.
    # (On v7x at production sizes, stream w1/w2 / chunk KV instead of raising this.)
    return int(min(128 * 1024 * 1024, resident_bytes + 32 * 1024 * 1024))


def transformer_block(x, prep, num_heads, *, q_tile=256, kv_tile=256):
    """x: (B, S, D) f32.  prep: output of prepare_params().  Eval-mode forward."""
    B, S, D = x.shape
    mlp_dim = prep["w1"].shape[1]
    bf16 = jnp.bfloat16

    TQ = min(q_tile, S)
    TS = min(kv_tile, S)
    assert S % TQ == 0 and S % TS == 0, "sequence length must be a multiple of the tiles"
    NQ, NS = S // TQ, S // TS

    def vmem_resident():
        return pl.BlockSpec(memory_space=pltpu.MemorySpace.VMEM)

    # ---------------- Kernel A: K/V projection ----------------
    kv_vmem = (2 * D * D * 2                      # wk, wv bf16
               + 8 * D * 4                        # biases / ln params
               + 2 * TS * D * 4                   # x tile, double-buffered
               + 2 * 2 * TS * D * 2               # k/v output tiles, double-buffered
               + 4 * TS * D * 4)                  # f32 temporaries
    kv_cost = pl.CostEstimate(
        flops=int(4 * B * S * D * D),
        transcendentals=int(B * S),
        bytes_accessed=int(B * S * D * 4 + 2 * B * S * D * 2 + 2 * D * D * 2))

    k_bf, v_bf = pl.pallas_call(
        kv_proj_kernel,
        out_shape=(jax.ShapeDtypeStruct((B, S, D), bf16),
                   jax.ShapeDtypeStruct((B, S, D), bf16)),
        grid=(B, NS),
        in_specs=[pl.BlockSpec((1, TS, D), lambda b, si: (b, si, 0))]
                 + [vmem_resident() for _ in range(6)],
        out_specs=[pl.BlockSpec((1, TS, D), lambda b, si: (b, si, 0)),
                   pl.BlockSpec((1, TS, D), lambda b, si: (b, si, 0))],
        compiler_params=pltpu.CompilerParams(
            dimension_semantics=("parallel", "parallel"),
            vmem_limit_bytes=_vmem_limit(kv_vmem)),
        cost_estimate=kv_cost,
    )(x, prep["ln1_g"], prep["ln1_b"], prep["wk"], prep["bk"], prep["wv"], prep["bv"])

    # ---------------- Kernel B: attention + MLP ----------------
    main_vmem = ((2 * D * D + 2 * D * mlp_dim) * 2   # wq, wo, w1, w2 bf16
                 + (8 * D + 2 * mlp_dim) * 4         # biases / ln params
                 + 2 * 2 * S * D * 2                 # K, V blocks double-buffered (bf16)
                 + 2 * 2 * TQ * D * 4                # x in + out, double-buffered
                 + TQ * D * 2                        # bf16 staging buffer
                 + 3 * TQ * S * 4                    # score / prob temporaries
                 + 2 * TQ * mlp_dim * 4              # MLP hidden temporaries
                 + 4 * TQ * D * 4)                   # misc f32 temporaries
    main_cost = pl.CostEstimate(
        flops=int(B * S * (4 * D * D + 4 * S * D + 4 * D * mlp_dim)),
        transcendentals=int(B * S * (num_heads * S + mlp_dim)),
        bytes_accessed=int(2 * B * S * D * 4 + 2 * B * S * D * 2
                           + (2 * D * D + 2 * D * mlp_dim) * 2))

    kernel = functools.partial(attn_mlp_kernel, num_heads=num_heads)

    return pl.pallas_call(
        kernel,
        out_shape=jax.ShapeDtypeStruct((B, S, D), jnp.float32),
        grid=(B, NQ),
        in_specs=[pl.BlockSpec((1, TQ, D), lambda b, qi: (b, qi, 0)),   # x tile
                  pl.BlockSpec((1, S, D), lambda b, qi: (b, 0, 0)),     # K (full seq)
                  pl.BlockSpec((1, S, D), lambda b, qi: (b, 0, 0))]     # V (full seq)
                 + [vmem_resident() for _ in range(12)],
        out_specs=pl.BlockSpec((1, TQ, D), lambda b, qi: (b, qi, 0)),
        scratch_shapes=[pltpu.VMEM((TQ, D), bf16)],      # per-head output staging
        compiler_params=pltpu.CompilerParams(
            dimension_semantics=("parallel", "parallel"),
            vmem_limit_bytes=_vmem_limit(main_vmem)),
        cost_estimate=main_cost,
    )(x, k_bf, v_bf,
      prep["ln1_g"], prep["ln1_b"],
      prep["wq"], prep["bq"], prep["wo"], prep["bo"],
      prep["ln2_g"], prep["ln2_b"],
      prep["w1"], prep["b1"], prep["w2"], prep["b2"])


# ------------------------------- params / reference ---------------------------------

def init_params(key, input_dim, num_heads, mlp_dim):
    ks = jax.random.split(key, 8)
    scl = lambda fan_in: 1.0 / math.sqrt(fan_in)
    return {
        "ln1_g": jnp.ones((1, input_dim), jnp.float32),
        "ln1_b": jnp.zeros((1, input_dim), jnp.float32),
        "ln2_g": jnp.ones((1, input_dim), jnp.float32),
        "ln2_b": jnp.zeros((1, input_dim), jnp.float32),
        "wq": jax.random.normal(ks[0], (input_dim, input_dim), jnp.float32) * scl(input_dim),
        "bq": jnp.zeros((1, input_dim), jnp.float32),
        "wk": jax.random.normal(ks[1], (input_dim, input_dim), jnp.float32) * scl(input_dim),
        "bk": jnp.zeros((1, input_dim), jnp.float32),
        "wv": jax.random.normal(ks[2], (input_dim, input_dim), jnp.float32) * scl(input_dim),
        "bv": jnp.zeros((1, input_dim), jnp.float32),
        "wo": jax.random.normal(ks[3], (input_dim, input_dim), jnp.float32) * scl(input_dim),
        "bo": jnp.zeros((1, input_dim), jnp.float32),
        "w1": jax.random.normal(ks[4], (input_dim, mlp_dim), jnp.float32) * scl(input_dim),
        "b1": jax.random.normal(ks[5], (1, mlp_dim), jnp.float32) * 0.01,
        "w2": jax.random.normal(ks[6], (mlp_dim, input_dim), jnp.float32) * scl(mlp_dim),
        "b2": jax.random.normal(ks[7], (1, input_dim), jnp.float32) * 0.01,
    }


def reference_block(x, p, num_heads):
    """Plain-JAX reference mirroring the PyTorch forward (eval mode, no dropout),
    with the same bf16-input / f32-accumulation matmul precision as the kernel."""
    B, S, D = x.shape
    hd = D // num_heads
    bf16 = jnp.bfloat16
    scale = 1.0 / math.sqrt(hd)

    def ln(v, g, b):
        mu = v.mean(-1, keepdims=True)
        var = ((v - mu) ** 2).mean(-1, keepdims=True)
        return (v - mu) / jnp.sqrt(var + 1e-5) * g + b

    def mm(a, w):
        return jnp.dot(a.astype(bf16), w.astype(bf16),
                       preferred_element_type=jnp.float32)

    x1 = ln(x, p["ln1_g"], p["ln1_b"])
    q = (mm(x1, p["wq"]) + p["bq"]) * scale
    k = mm(x1, p["wk"]) + p["bk"]
    v = mm(x1, p["wv"]) + p["bv"]
    q = q.reshape(B, S, num_heads, hd).transpose(0, 2, 1, 3)
    k = k.reshape(B, S, num_heads, hd).transpose(0, 2, 1, 3)
    v = v.reshape(B, S, num_heads, hd).transpose(0, 2, 1, 3)
    s = jnp.einsum("bhqd,bhkd->bhqk", q.astype(bf16), k.astype(bf16),
                   preferred_element_type=jnp.float32)
    a = jax.nn.softmax(s, axis=-1)
    o = jnp.einsum("bhqk,bhkd->bhqd", a.astype(bf16), v.astype(bf16),
                   preferred_element_type=jnp.float32)
    o = o.transpose(0, 2, 1, 3).reshape(B, S, D)
    attn_out = mm(o, p["wo"]) + p["bo"]
    x2 = attn_out + x
    x3 = ln(x2, p["ln2_g"], p["ln2_b"])
    h = mm(x3, p["w1"]) + p["b1"]
    h = 0.5 * h * (1.0 + jax.lax.erf(h / math.sqrt(2.0)))
    h = mm(h, p["w2"]) + p["b2"]
    return x2 + h


if __name__ == "__main__":
    # Modest shapes that still exercise (8,128) tiling, lane-axis head slicing and
    # the multi-tile query/sequence grid (per review's correctness concern).
    B, S, D, H, MLP = 2, 512, 256, 4, 512
    key = jax.random.PRNGKey(0)
    kx, kp = jax.random.split(key)
    x = jax.random.normal(kx, (B, S, D), jnp.float32)
    params = init_params(kp, D, H, MLP)
    prep = prepare_params(params, H)          # one-time weight prep (bf16 + scale fold)

    out = transformer_block(x, prep, num_heads=H)
    out = jax.block_until_ready(out)

    ref = reference_block(x, params, H)
    assert out.shape == (B, S, D)
    err = float(jnp.max(jnp.abs(out - ref)))
    assert err < 3e-2, f"max abs error vs reference: {err}"
    print("KERNEL_OK")
</pallas_src>

<mosaic_0001>
module attributes {stable_mosaic.version = 11 : i64} {
  func.func @kv_proj_kernel(%arg0: i32, %arg1: i32, %arg2: memref<1x256x256xf32, #tpu.memory_space<vmem>>, %arg3: memref<1x256xf32, #tpu.memory_space<vmem>>, %arg4: memref<1x256xf32, #tpu.memory_space<vmem>>, %arg5: memref<256x256xbf16, #tpu.memory_space<vmem>>, %arg6: memref<1x256xf32, #tpu.memory_space<vmem>>, %arg7: memref<256x256xbf16, #tpu.memory_space<vmem>>, %arg8: memref<1x256xf32, #tpu.memory_space<vmem>>, %arg9: memref<1x256x256xbf16, #tpu.memory_space<vmem>>, %arg10: memref<1x256x256xbf16, #tpu.memory_space<vmem>>) attributes {dimension_semantics = [#tpu.dimension_semantics<parallel>, #tpu.dimension_semantics<parallel>], iteration_bounds = array<i64: 2, 2>, scalar_prefetch = 0 : i64, scratch_operands = 0 : i64, tpu.core_type = #tpu.core_type<tc>, window_params = [{transform_indices = @transform_0, window_bounds = array<i64: 1, 256, 256>}, {pipeline_mode = #tpu.pipeline_mode<synchronous>, transform_indices = @transform_1, window_bounds = array<i64: 1, 256>}, {pipeline_mode = #tpu.pipeline_mode<synchronous>, transform_indices = @transform_2, window_bounds = array<i64: 1, 256>}, {pipeline_mode = #tpu.pipeline_mode<synchronous>, transform_indices = @transform_3, window_bounds = array<i64: 256, 256>}, {pipeline_mode = #tpu.pipeline_mode<synchronous>, transform_indices = @transform_4, window_bounds = array<i64: 1, 256>}, {pipeline_mode = #tpu.pipeline_mode<synchronous>, transform_indices = @transform_5, window_bounds = array<i64: 256, 256>}, {pipeline_mode = #tpu.pipeline_mode<synchronous>, transform_indices = @transform_6, window_bounds = array<i64: 1, 256>}, {transform_indices = @transform_7, window_bounds = array<i64: 1, 256, 256>}, {transform_indices = @transform_8, window_bounds = array<i64: 1, 256, 256>}]} {
    %c0 = arith.constant 0 : index
    %c0_0 = arith.constant 0 : index
    %c0_1 = arith.constant 0 : index
    %0 = vector.load %arg2[%c0, %c0_0, %c0_1] : memref<1x256x256xf32, #tpu.memory_space<vmem>>, vector<1x256x256xf32>
    %1 = vector.shape_cast %0 : vector<1x256x256xf32> to vector<256x256xf32>
    %c0_2 = arith.constant 0 : index
    %c0_3 = arith.constant 0 : index
    %2 = vector.load %arg3[%c0_2, %c0_3] : memref<1x256xf32, #tpu.memory_space<vmem>>, vector<1x256xf32>
    %3 = vector.shape_cast %2 : vector<1x256xf32> to vector<256xf32>
    %c0_4 = arith.constant 0 : index
    %c0_5 = arith.constant 0 : index
    %4 = vector.load %arg4[%c0_4, %c0_5] : memref<1x256xf32, #tpu.memory_space<vmem>>, vector<1x256xf32>
    %5 = vector.shape_cast %4 : vector<1x256xf32> to vector<256xf32>
    %cst = arith.constant dense<0.000000e+00> : vector<256xf32>
    %6 = vector.multi_reduction <add>, %1, %cst [1] : vector<256x256xf32> to vector<256xf32>
    %7 = vector.shape_cast %6 : vector<256xf32> to vector<256x1xf32>
    %cst_6 = arith.constant 2.560000e+02 : f32
    %8 = vector.broadcast %cst_6 : f32 to vector<256x1xf32>
    %9 = arith.divf %7, %8 : vector<256x1xf32>
    %10 = vector.broadcast %9 : vector<256x1xf32> to vector<256x256xf32>
    %11 = arith.subf %1, %10 : vector<256x256xf32>
    %12 = arith.mulf %11, %11 : vector<256x256xf32>
    %cst_7 = arith.constant dense<0.000000e+00> : vector<256xf32>
    %13 = vector.multi_reduction <add>, %12, %cst_7 [1] : vector<256x256xf32> to vector<256xf32>
    %14 = vector.shape_cast %13 : vector<256xf32> to vector<256x1xf32>
    %cst_8 = arith.constant 2.560000e+02 : f32
    %15 = vector.broadcast %cst_8 : f32 to vector<256x1xf32>
    %16 = arith.divf %14, %15 : vector<256x1xf32>
    %17 = vector.broadcast %9 : vector<256x1xf32> to vector<256x256xf32>
    %18 = arith.subf %1, %17 : vector<256x256xf32>
    %cst_9 = arith.constant 9.99999974E-6 : f32
    %19 = vector.broadcast %cst_9 : f32 to vector<256x1xf32>
    %20 = arith.addf %16, %19 : vector<256x1xf32>
    %21 = math.rsqrt %20 : vector<256x1xf32>
    %22 = vector.broadcast %21 : vector<256x1xf32> to vector<256x256xf32>
    %23 = arith.mulf %18, %22 : vector<256x256xf32>
    %24 = vector.shape_cast %3 : vector<256xf32> to vector<1x256xf32>
    %25 = vector.broadcast %24 : vector<1x256xf32> to vector<256x256xf32>
    %26 = arith.mulf %23, %25 : vector<256x256xf32>
    %27 = vector.shape_cast %5 : vector<256xf32> to vector<1x256xf32>
    %28 = vector.broadcast %27 : vector<1x256xf32> to vector<256x256xf32>
    %29 = arith.addf %26, %28 : vector<256x256xf32>
    %30 = arith.truncf %29 : vector<256x256xf32> to vector<256x256xbf16>
    %c0_10 = arith.constant 0 : index
    %c0_11 = arith.constant 0 : index
    %31 = vector.load %arg5[%c0_10, %c0_11] : memref<256x256xbf16, #tpu.memory_space<vmem>>, vector<256x256xbf16>
    %cst_12 = arith.constant dense<0.000000e+00> : vector<256x256xf32>
    %32 = tpu.matmul %30, %31, %cst_12 {dimension_numbers = #tpu.dot_dimension_numbers<[1], [0], [0], [1], [0, 0, 1, 1], [], []>} : vector<256x256xbf16>, vector<256x256xbf16>, vector<256x256xf32> -> vector<256x256xf32>
    %c0_13 = arith.constant 0 : index
    %c0_14 = arith.constant 0 : index
    %33 = vector.load %arg6[%c0_13, %c0_14] : memref<1x256xf32, #tpu.memory_space<vmem>>, vector<1x256xf32>
    %34 = vector.shape_cast %33 : vector<1x256xf32> to vector<256xf32>
    %35 = vector.shape_cast %34 : vector<256xf32> to vector<1x256xf32>
    %36 = vector.broadcast %35 : vector<1x256xf32> to vector<256x256xf32>
    %37 = arith.addf %32, %36 : vector<256x256xf32>
    %c0_15 = arith.constant 0 : index
    %c0_16 = arith.constant 0 : index
    %38 = vector.load %arg7[%c0_15, %c0_16] : memref<256x256xbf16, #tpu.memory_space<vmem>>, vector<256x256xbf16>
    %cst_17 = arith.constant dense<0.000000e+00> : vector<256x256xf32>
    %39 = tpu.matmul %30, %38, %cst_17 {dimension_numbers = #tpu.dot_dimension_numbers<[1], [0], [0], [1], [0, 0, 1, 1], [], []>} : vector<256x256xbf16>, vector<256x256xbf16>, vector<256x256xf32> -> vector<256x256xf32>
    %c0_18 = arith.constant 0 : index
    %c0_19 = arith.constant 0 : index
    %40 = vector.load %arg8[%c0_18, %c0_19] : memref<1x256xf32, #tpu.memory_space<vmem>>, vector<1x256xf32>
    %41 = vector.shape_cast %40 : vector<1x256xf32> to vector<256xf32>
    %42 = vector.shape_cast %41 : vector<256xf32> to vector<1x256xf32>
    %43 = vector.broadcast %42 : vector<1x256xf32> to vector<256x256xf32>
    %44 = arith.addf %39, %43 : vector<256x256xf32>
    %45 = arith.truncf %37 : vector<256x256xf32> to vector<256x256xbf16>
    %c0_20 = arith.constant 0 : index
    %c0_21 = arith.constant 0 : index
    %c0_22 = arith.constant 0 : index
    %46 = vector.load %arg9[%c0_20, %c0_21, %c0_22] : memref<1x256x256xbf16, #tpu.memory_space<vmem>>, vector<1x256x256xbf16>
    %47 = vector.shape_cast %46 : vector<1x256x256xbf16> to vector<256x256xbf16>
    %48 = vector.shape_cast %45 : vector<256x256xbf16> to vector<1x256x256xbf16>
    tpu.vector_store %arg9[%c0_20, %c0_21, %c0_22], %48 {strides = array<i32>} : memref<1x256x256xbf16, #tpu.memory_space<vmem>>, vector<1x256x256xbf16>,
    %49 = arith.truncf %44 : vector<256x256xf32> to vector<256x256xbf16>
    %c0_23 = arith.constant 0 : index
    %c0_24 = arith.constant 0 : index
    %c0_25 = arith.constant 0 : index
    %50 = vector.load %arg10[%c0_23, %c0_24, %c0_25] : memref<1x256x256xbf16, #tpu.memory_space<vmem>>, vector<1x256x256xbf16>
    %51 = vector.shape_cast %50 : vector<1x256x256xbf16> to vector<256x256xbf16>
    %52 = vector.shape_cast %49 : vector<256x256xbf16> to vector<1x256x256xbf16>
    tpu.vector_store %arg10[%c0_23, %c0_24, %c0_25], %52 {strides = array<i32>} : memref<1x256x256xbf16, #tpu.memory_space<vmem>>, vector<1x256x256xbf16>,
    return
  }
  func.func @transform_0(%arg0: i32, %arg1: i32) -> (i32, i32, i32) {
    %c0_i32 = arith.constant 0 : i32
    %c0_i32_0 = arith.constant 0 : i32
    return %arg0, %arg1, %c0_i32 : i32, i32, i32
  }
  func.func @transform_1(%arg0: i32, %arg1: i32) -> (i32, i32) {
    %c0_i32 = arith.constant 0 : i32
    %c0_i32_0 = arith.constant 0 : i32
    %c0_i32_1 = arith.constant 0 : i32
    return %c0_i32, %c0_i32_0 : i32, i32
  }
  func.func @transform_2(%arg0: i32, %arg1: i32) -> (i32, i32) {
    %c0_i32 = arith.constant 0 : i32
    %c0_i32_0 = arith.constant 0 : i32
    %c0_i32_1 = arith.constant 0 : i32
    return %c0_i32, %c0_i32_0 : i32, i32
  }
  func.func @transform_3(%arg0: i32, %arg1: i32) -> (i32, i32) {
    %c0_i32 = arith.constant 0 : i32
    %c0_i32_0 = arith.constant 0 : i32
    %c0_i32_1 = arith.constant 0 : i32
    return %c0_i32, %c0_i32_0 : i32, i32
  }
  func.func @transform_4(%arg0: i32, %arg1: i32) -> (i32, i32) {
    %c0_i32 = arith.constant 0 : i32
    %c0_i32_0 = arith.constant 0 : i32
    %c0_i32_1 = arith.constant 0 : i32
    return %c0_i32, %c0_i32_0 : i32, i32
  }
  func.func @transform_5(%arg0: i32, %arg1: i32) -> (i32, i32) {
    %c0_i32 = arith.constant 0 : i32
    %c0_i32_0 = arith.constant 0 : i32
    %c0_i32_1 = arith.constant 0 : i32
    return %c0_i32, %c0_i32_0 : i32, i32
  }
  func.func @transform_6(%arg0: i32, %arg1: i32) -> (i32, i32) {
    %c0_i32 = arith.constant 0 : i32
    %c0_i32_0 = arith.constant 0 : i32
    %c0_i32_1 = arith.constant 0 : i32
    return %c0_i32, %c0_i32_0 : i32, i32
  }
  func.func @transform_7(%arg0: i32, %arg1: i32) -> (i32, i32, i32) {
    %c0_i32 = arith.constant 0 : i32
    %c0_i32_0 = arith.constant 0 : i32
    return %arg0, %arg1, %c0_i32 : i32, i32, i32
  }
  func.func @transform_8(%arg0: i32, %arg1: i32) -> (i32, i32, i32) {
    %c0_i32 = arith.constant 0 : i32
    %c0_i32_0 = arith.constant 0 : i32
    return %arg0, %arg1, %c0_i32 : i32, i32, i32
  }
}

</mosaic_0001>

<bundles_post_ra>
// kernel: tpu_custom_call.1
= control target key start
LH: loop header
LB: loop body
LE: loop exit
PB: predicated region body
PF: predicated region fallthrough
CT: control target
= control target key end

     0   :  { %s4676_s0 = inlined_call_operand.hbm [shape: f32[2,512,256], index: 0, kind: input, shape index: {}]   ;;  %s4677_s1 = inlined_call_operand.vmem [shape: f32[1,256], index: 1, kind: input, shape index: {}]   ;;  %s4678_s2 = inlined_call_operand.vmem [shape: f32[1,256], index: 2, kind: input, shape index: {}]   ;;  %s4679_s3 = inlined_call_operand.hbm [shape: bf16[256,256], index: 3, kind: input, shape index: {}]   ;;  %s4680_s4 = inlined_call_operand.vmem [shape: f32[1,256], index: 4, kind: input, shape index: {}]   ;;  %s4681_s5 = inlined_call_operand.hbm [shape: bf16[256,256], index: 5, kind: input, shape index: {}]   ;;  %s4682_s6 = inlined_call_operand.vmem [shape: f32[1,256], index: 6, kind: input, shape index: {}]   ;;  %s4683_s7 = inlined_call_operand.hbm [shape: bf16[2,512,256], index: 7, kind: output, shape index: {0}]   ;;  %s4684_s8 = inlined_call_operand.hbm [shape: bf16[2,512,256], index: 8, kind: output, shape index: {1}]  }
   0x1   :  { %4729 = sst [smem:[#allocation48_spill]] %s4679_s3 }
   0x2   :  { %4730 = sst [smem:[#allocation49_spill]] %s4681_s5 }
   0x3   :  { %4731 = sst [smem:[#allocation50_spill]] %s4683_s7 }
   0x4   :  { %4732 = sst [smem:[#allocation51_spill]] %s4684_s8 }
   0x5   :  { %14 = vsyncpa [#allocation3], 0 }
   0x6   :  { %16 = vsyncpa [#allocation3 + $0x1], 0 }
   0x7   :  { %17 = vsyncpa [#allocation6], 0 }
   0x8   :  { %18 = vsyncpa [#allocation4], 0 }
   0x9   :  { %20 = vsyncpa [#allocation4 + $0x1], 0 }
   0xa   :  { %21 = vsyncpa [#allocation10], 0 }
   0xb   :  { %23 = vsyncpa [#allocation10 + $0x1], 0  ;;  %s3348_s27 = smov 0   ;;  %s3350_s28 = smov 0  }
   0xc   :  { %s3352_s29 = smov 0   ;;  %s3354_s30 = smov 0  }
   0xd   :  { %s3356_s9 = smov 0   ;;  %s3358_s10 = smov 0  }
   0xe   :  { %s3360_s11 = smov 0   ;;  %s3362_s12 = smov 0  }
   0xf LB: > { %4733 = sst [smem:[#allocation15_spill]] %s3262_s27  ;;  %s2576_s13 = sadd.s32 4294967295, %s3290_s12   ;;  %s3290_s12 = sphi %s3362_s12, %s29_s12   ;;  %s3286_s11 = sphi %s3360_s11, %s4832_s11   ;;  %s3282_s10 = sphi %s3358_s10, %s4831_s10   ;;  %s3278_s9 = sphi %s3356_s9, %s4830_s9   ;;  %s3274_s30 = sphi %s3354_s30, %s4829_s30   ;;  %s3270_s29 = sphi %s3352_s29, %s4828_s29   ;;  %s3266_s28 = sphi %s3350_s28, %s4827_s28   ;;  %s3262_s27 = sphi %s3348_s27, %s4826_s27  }
  0x10   : > { %4734 = sst [smem:[#allocation16_spill]] %s3274_s30  ;;  %s2577_s14 = sadd.s32 4294967294, %s3290_s12  }
  0x11   : > { %4735 = sst [smem:[#allocation17_spill]] %s3278_s9  ;;  %p63_p0 = scmp.ne.s32.totalorder %s3266_s28, %s3262_s27 }
  0x12   : > { %p3392_p1 = scmp.eq.s32.totalorder %s2576_s13, 0  ;;  %p3396_p2 = scmp.eq.s32.totalorder %s2576_s13, 3 }
  0x13   : > { %p221_p3 = scmp.eq.s32.totalorder %s2577_s14, 3  ;;  %p2578_p5 = scmp.ge.s32.totalorder %s3290_s12, 1 }
  0x14   : > { %s4736_s15 = scalar_select %p3392_p1, 1, 0 }
  0x15   : > { %s4737_s16 = scalar_select %p3396_p2, 1, 0 }
  0x16   : > { %p3402_p4 = por %p3392_p1, %p63_p0  ;;  %p3407_p6 = por %p221_p3, %p63_p0 }
  0x17   : > { %p256_p7 = scmp.lt.s32.totalorder %s3290_s12, 5  ;;  %s3292_s20 = smov [#allocation5]  }
  0x18   : > { %s4738_s17 = scalar_select %p3402_p4, 1, 0 }
  0x19   : > { %s4739_s18 = scalar_select %p3407_p6, 1, 0 }
  0x1a   : > { %p3412_p8 = pnand %p2578_p5, %p256_p7  ;;  %s274_s21 = sshll.u32 %s3292_s20, 4  ;;  %s275_s21 = int_to_ptr.vmem [resolvable:$true] %s274_s21 }
  0x1b   : > { %4740 = sst [smem:[#allocation18_spill]] %s4739_s18  ;;  %s3293_s23 = smov [#allocation7]  }
  0x1c   : > { %s4741_s19 = scalar_select %p3412_p8, 1, 0 }
  0x1d   : > { %p2814_p9 = pneg %p3412_p8  ;;  %s290_s24 = sshll.u32 %s3293_s23, 4  ;;  %s3424_s24 = int_to_ptr.vmem [resolvable:$true] %s290_s24 }
  0x1e   : > { %s4743_s3 = sld [smem:[#allocation48_spill]] }
  0x1f   : > { %p3420_p10 = pnand %p2814_p9, %p3392_p1 }
  0x21   : > { %p3072_p12 = pneg %p3420_p10 }
  0x24   : > { %s3070_s13 = scalar_lea.hbm %s4743_s3, 4096 }
  0x25   : > { %p3071_p11 = scmp.ne.s32.totalorder %s4743_s3, %s3070_s13  ;;  %p3077_p3 = scmp.lt.u32.totalorder %s3070_s13, %s4743_s3 }
  0x27   : > { %p3073_p13 = pnand %p3072_p12, %p3071_p11 }
  0x29   : > { %p3074_p0 = pneg %p3073_p13 }
  0x2b   : > { %p3079_p5 = pnand %p3077_p3, %p3074_p0 }
  0x2d   : > { %3082 = shalt.err (!%p3079_p5)
}
  0x2e   : > { %s3083_s23 = scalar_lea.vmem %s275_s21, 4096  ;;  %p3091_p1 = scmp.lt.s32.totalorder %s275_s21, %s275_s21 }
  0x2f   : > { %p3084_p7 = scmp.ne.s32.totalorder %s275_s21, %s3083_s23  ;;  %p3092_p4 = scmp.lt.s32.totalorder %s3083_s23, %s3083_s23 }
  0x31   : > { %p3086_p9 = pnand %p3084_p7, %p3072_p12  ;;  %p3093_p8 = por %p3092_p4, %p3091_p1 }
  0x33   : > { %p3087_p6 = pneg %p3086_p9 }
  0x35   : > { %p3094_p2 = pnand %p3093_p8, %p3087_p6 }
  0x37   : > { %3097 = shalt.err (!%p3094_p2)
}
  0x38   : > { %s3294_s25 = smov 128   ;;  %s3295_s26 = smov 8  }
  0x39   : > { %2817 = dma.hbm_to_vmem [thread:$0]  (!%p3420_p10), %s4743_s3, 4096, %s275_s21, [#allocation6], %s3294_s25, %s3294_s25, %s3295_s26  }
  0x3a   : > { %s4744_s5 = sld [smem:[#allocation49_spill]] }
  0x40   : > { %s3098_s20 = scalar_lea.hbm %s4744_s5, 4096 }
  0x41   : > { %p3099_p11 = scmp.ne.s32.totalorder %s4744_s5, %s3098_s20  ;;  %p3105_p4 = scmp.lt.u32.totalorder %s3098_s20, %s4744_s5 }
  0x43   : > { %p3101_p1 = pnand %p3099_p11, %p3072_p12 }
  0x45   : > { %p3102_p2 = pneg %p3101_p1 }
  0x47   : > { %p3107_p6 = pnand %p3105_p4, %p3102_p2 }
  0x49   : > { %3110 = shalt.err (!%p3107_p6)
}
  0x4a   : > { %s3111_s21 = scalar_lea.vmem %s3424_s24, 4096  ;;  %p3119_p3 = scmp.lt.s32.totalorder %s3424_s24, %s3424_s24 }
  0x4b   : > { %p3112_p8 = scmp.ne.s32.totalorder %s3424_s24, %s3111_s21  ;;  %p3120_p5 = scmp.lt.s32.totalorder %s3111_s21, %s3111_s21 }
  0x4d   : > { %p3114_p13 = pnand %p3112_p8, %p3072_p12  ;;  %p3121_p7 = por %p3120_p5, %p3119_p3 }
  0x4f   : > { %p3115_p0 = pneg %p3114_p13 }
  0x51   : > { %p3122_p9 = pnand %p3121_p7, %p3115_p0 }
  0x53   : > { %3125 = shalt.err (!%p3122_p9)
}
  0x54   : > { %2820 = dma.hbm_to_vmem [thread:$0]  (!%p3420_p10), %s4744_s5, 4096, %s3424_s24, [#allocation6], %s3294_s25, %s3294_s25, %s3295_s26  }
  0x55   : > { %s38_s9 = sadd.s32 1, %s3282_s10  ;;  %s41_s27 = sadd.s32 1, %s3286_s11 }
  0x56   : > { %p39_p12 = scmp.ge.s32.totalorder %s38_s9, 2  ;;  %s50_s22 = sadd.s32 1, %s3270_s29 }
  0x57   : > { %p57_p11 = scmp.ne.s32.totalorder %s3270_s29, %s3266_s28  ;;  %p58_p1 = scmp.eq.s32.totalorder %s3290_s12, 0 }
  0x58   : > { %s4834_s9 = smov (%p39_p12, %s38_s9), 0  ;;  %s4836_s27 = smov (!%p39_p12, %s41_s27), %s3286_s11 }
  0x59   : > { %4745 = sst [smem:[#allocation19_spill]] %s4834_s9  ;;  %s46_s18 = ssub.s32 %s3282_s10, %s4834_s9 }
  0x5a   : > { %p3484_p2 = por %p58_p1, %p57_p11  ;;  %p43_p10 = scmp.ge.s32.totalorder %s4836_s27, 2 }
  0x5b   : > { %p4747_p4 = scmp.ne.s32.totalorder %s4737_s16, 0  ;;  %p2834_p8 = scmp.lt.s32.totalorder %s3290_s12, 4 }
  0x5c   : > { %s307_s25 = sand.u32 1, %s3270_s29   ;;  %s4838_s27 = smov (%p43_p10, %s4836_s27), 0 }
  0x5d   : > { %p3490_p6 = por %p4747_p4, %p57_p11  ;;  %s2582_s26 = sshll.u32 %s307_s25, 9 }
  0x5e   : > { %s45_s14 = ssub.s32 %s3286_s11, %s4838_s27  ;;  %s2733_s23 = sshll.u32 %s3282_s10, 6 }
  0x5f   : > { %s4748_s24 = scalar_select %p3490_p6, 1, 0 }
  0x60   : > { %s47_s20 = sor.u32 %s46_s18, %s45_s14  ;;  %s2585_s21 = sshll.u32 %s3286_s11, 7 }
  0x61   : > { %4749 = sst [smem:[#allocation20_spill]] %s4748_s24  ;;  %p48_p13 = scmp.eq.s32.totalorder %s47_s20, 0 }
  0x62   : > { %s318_s7 = sadd.s32 %s2733_s23, %s2585_s21  ;;  %s311_s8 = scalar_lea.vmem [#allocation2], %s2582_s26 }
  0x63   : > { %s321_s16 = sshll.u32 %s311_s8, 4  ;;  %s2586_s5 = sshll.u32 %s318_s7, 7  ;;  %s3505_s16 = int_to_ptr.vmem [resolvable:$true] %s321_s16 }
  0x64   : > { %s3503_s3 = scalar_select %p48_p13, %s3270_s29, %s50_s22  }
  0x65   : > { %s3510_s30 = scalar_lea.hbm %s4676_s0, %s2586_s5  ;;  %p3516_p0 = pnand %p2834_p8, %p3484_p2 }
  0x66   : > { %s3520_s22 = scalar_lea.sflag [#allocation3], %s307_s25  ;;  %s3126_s26 = scalar_lea.hbm %s3510_s30, 8192 }
  0x67   : > { %p3127_p3 = scmp.ne.s32.totalorder %s3510_s30, %s3126_s26  ;;  %p3128_p5 = pneg %p3516_p0 }
  0x68   : > { %s3131_s13 = scalar_lea.hbm %s4676_s0, 32768  ;;  %p3132_p12 = scmp.lt.u32.totalorder %s3510_s30, %s4676_s0 }
  0x69   : > { %p3129_p7 = pnand %p3128_p5, %p3127_p3  ;;  %p3133_p11 = scmp.lt.u32.totalorder %s3131_s13, %s3126_s26 }
  0x6a   : > { %p3135_p2 = scmp.lt.u32.totalorder %s3126_s26, %s3510_s30 }
  0x6b   : > { %p3130_p9 = pneg %p3129_p7  ;;  %p3134_p1 = por %p3133_p11, %p3132_p12 }
  0x6d   : > { %p3136_p10 = por %p3135_p2, %p3134_p1 }
  0x6f   : > { %p3137_p4 = pnand %p3136_p10, %p3130_p9 }
  0x71   : > { %3140 = shalt.err (!%p3137_p4)
}
  0x72   : > { %s3141_s25 = scalar_lea.vmem %s3505_s16, 8192  ;;  %s3296_s20 = smov [#allocation2]  }
  0x73   : > { %p3142_p8 = scmp.ne.s32.totalorder %s3505_s16, %s3141_s25  ;;  %s3146_s23 = sshll.u32 %s3296_s20, 4  ;;  %s3147_s23 = int_to_ptr.vmem [resolvable:$false] %s3146_s23 }
  0x74   : > { %s3148_s21 = scalar_lea.vmem %s3147_s23, 16384  ;;  %p3149_p7 = scmp.lt.s32.totalorder %s3505_s16, %s3147_s23 }
  0x75   : > { %p3144_p13 = pnand %p3142_p8, %p3128_p5  ;;  %p3150_p12 = scmp.lt.s32.totalorder %s3148_s21, %s3141_s25 }
  0x77   : > { %p3145_p3 = pneg %p3144_p13  ;;  %p3151_p11 = por %p3150_p12, %p3149_p7 }
  0x79   : > { %p3152_p1 = pnand %p3151_p11, %p3145_p3 }
  0x7b   : > { %3155 = shalt.err (!%p3152_p1)
}
  0x7c   : > { %s3297_s7 = smov 256   ;;  %s3298_s8 = smov 16  }
  0x7d   : > { %2824 = dma.hbm_to_vmem [thread:$0]  (!%p3516_p0), %s3510_s30, 8192, %s3505_s16, %s3520_s22, %s3297_s7, %s3297_s7, %s3298_s8  }
  0x7e   : > { %p4751_p5 = scmp.ne.s32.totalorder %s4741_s19, 0 }
  0x80   : > { %333 = sbr.rel (%p4751_p5) target bundleno = 910 (0x38e), region = 48 }
  0x87   : > { %s3551_s26 = sand.u32 1, %s3266_s28   ;;  %p4752_p9 = scmp.ne.s32.totalorder %s4738_s17, 0 }
  0x88   : > { %s2588_s5 = sshll.u32 %s3551_s26, 9  ;;  %s336_s9 = scalar_lea.sflag [#allocation3], %s3551_s26 }
  0x89   : > { %s3555_s13 = scalar_lea.vmem [#allocation2], %s2588_s5 }
  0x8a   : > { %3245 = dma.done.wait (%p4752_p9), %s336_s9, 8192  }
  0x8b   : > { %3247 = vsyncadd (%p4752_p9), %s336_s9, 4294959104  ;;  %p4753_p0 = scmp.ne.s32.totalorder %s4736_s15, 0 }
  0x8d   : > { %3249 = dma.done.wait (%p4753_p0), [#allocation6], 8192  }
  0x8e   : > { %3251 = vsyncadd (%p4753_p0), [#allocation6], 4294959104  ;;  %v3566_v0 = vld [vmem:[%s3555_s13] sm:$0xff]  ;;  %v3569_v1 = vld [vmem:[%s3555_s13 + $0x8] sm:$0xff]  ;;  %s2591_s14 = sshll.u32 %s3551_s26, 8  ;;  %s4816_s23 = sld [smem:[#allocation16_spill]] }
  0x8f   : > { %v3572_v2 = vld [vmem:[%s3555_s13 + $0x10] sm:$0xff]  ;;  %v454_v3 = vadd.f32 %v3569_v1, %v3566_v0  ;;  %v3577_v4 = vld [vmem:[%s3555_s13 + $0x18] sm:$0xff]  ;;  %v3580_v5 = vld [vmem:[%s3555_s13 + $0x20] sm:$0xff]  ;;  %s4385_s25 = scalar_lea.vmem [#allocation8], %s2591_s14  ;;  %s4388_s20 = scalar_lea.vmem [#allocation9], %s2591_s14 }
  0x90   : > { %v3583_v6 = vld [vmem:[%s3555_s13 + $0x28] sm:$0xff]  ;;  %v3588_v8 = vld [vmem:[%s3555_s13 + $0x30] sm:$0xff]  ;;  %v3591_v9 = vld [vmem:[%s3555_s13 + $0x38] sm:$0xff]  ;;  %v457_v10 = vadd.f32 %v3577_v4, %v3572_v2  ;;  %s4817_s21 = sld [smem:[#allocation17_spill]]  ;;  %s2413_s9 = sshll.u32 %s4385_s25, 4  ;;  %s4575_s9 = int_to_ptr.vmem [resolvable:$true] %s2413_s9 }
  0x91   : > { %v460_v7 = vadd.f32 %v3583_v6, %v3580_v5  ;;  %455 = vadd.xlane.f32.xlu0 %v454_v3  ;;  %v463_v11 = vadd.f32 %v3591_v9, %v3588_v8  ;;  %v3598_v12 = vld [vmem:[%s3555_s13 + $0x40] sm:$0xff]  ;;  %v3601_v13 = vld [vmem:[%s3555_s13 + $0x48] sm:$0xff]  ;;  %v3604_v14 = vld [vmem:[%s3555_s13 + $0x50] sm:$0xff]  ;;  %s2432_s15 = sshll.u32 %s4388_s20, 4  ;;  %s4819_s16 = sld [smem:[#allocation50_spill]]  ;;  %s4590_s15 = int_to_ptr.vmem [resolvable:$true] %s2432_s15 }
  0x92   : > { %v3607_v15 = vld [vmem:[%s3555_s13 + $0x58] sm:$0xff]  ;;  %v466_v16 = vadd.f32 %v3601_v13, %v3598_v12  ;;  %v3614_v18 = vld [vmem:[%s3555_s13 + $0x60] sm:$0xff]  ;;  %v3617_v19 = vld [vmem:[%s3555_s13 + $0x68] sm:$0xff]  ;;  %s4820_s14 = sld [smem:[#allocation51_spill]] }
  0x93   : > { %461 = vadd.xlane.f32.xlu1 %v460_v7  ;;  %v469_v17 = vadd.f32 %v3607_v15, %v3604_v14  ;;  %v3620_v20 = vld [vmem:[%s3555_s13 + $0x70] sm:$0xff]  ;;  %v3623_v21 = vld [vmem:[%s3555_s13 + $0x78] sm:$0xff]  ;;  %v472_v22 = vadd.f32 %v3617_v19, %v3614_v18  ;;  %v3630_v24 = vld [vmem:[%s3555_s13 + $0x80] sm:$0xff] }
  0x94   : > { %v475_v23 = vadd.f32 %v3623_v21, %v3620_v20  ;;  %v3633_v25 = vld [vmem:[%s3555_s13 + $0x88] sm:$0xff]  ;;  %v3636_v26 = vld [vmem:[%s3555_s13 + $0x90] sm:$0xff]  ;;  %v3639_v27 = vld [vmem:[%s3555_s13 + $0x98] sm:$0xff]  ;;  %s2798_s7 = sshll.u32 %s4816_s23, 6 }
  0x95   : > { %458 = vadd.xlane.f32.xlu0 %v457_v10  ;;  %v3642_v28 = vld [vmem:[%s3555_s13 + $0xa0] sm:$0xff]  ;;  %v3645_v29 = vld [vmem:[%s3555_s13 + $0xa8] sm:$0xff]  ;;  %v478_v30 = vadd.f32 %v3633_v25, %v3630_v24  ;;  %v3650_v31 = vld [vmem:[%s3555_s13 + $0xb0] sm:$0xff]  ;;  %v481_v33 = vadd.f32 %v3639_v27, %v3636_v26 }
  0x96   : > { %v3653_v32 = vld [vmem:[%s3555_s13 + $0xb8] sm:$0xff]  ;;  %v3658_v34 = vld [vmem:[%s3555_s13 + $0xc0] sm:$0xff]  ;;  %v3661_v35 = vld [vmem:[%s3555_s13 + $0xc8] sm:$0xff]  ;;  %v484_v36 = vadd.f32 %v3645_v29, %v3642_v28  ;;  %s2725_s8 = sshll.u32 %s4817_s21, 7  ;;  %s2392_s21 = scalar_lea.sflag [#allocation4], %s3551_s26 }
  0x97   : > { %464 = vadd.xlane.f32.xlu1 %v463_v11  ;;  %v3666_v37 = vld [vmem:[%s3555_s13 + $0xd0] sm:$0xff]  ;;  %v3669_v38 = vld [vmem:[%s3555_s13 + $0xd8] sm:$0xff]  ;;  %v487_v39 = vadd.f32 %v3653_v32, %v3650_v31  ;;  %v3674_v40 = vld [vmem:[%s3555_s13 + $0xe0] sm:$0xff]  ;;  %v490_v42 = vadd.f32 %v3661_v35, %v3658_v34  ;;  %s4561_s5 = sadd.s32 %s2798_s7, %s2725_s8  ;;  %s3156_s7 = scalar_lea.vmem %s4575_s9, 4096 }
  0x98   : > { %v3677_v41 = vld [vmem:[%s3555_s13 + $0xe8] sm:$0xff]  ;;  %v493_v43 = vadd.f32 %v3669_v38, %v3666_v37  ;;  %v3684_v44 = vld [vmem:[%s3555_s13 + $0xf0] sm:$0xff]  ;;  %v3687_v45 = vld [vmem:[%s3555_s13 + $0xf8] sm:$0xff]  ;;  %p3157_p2 = scmp.ne.s32.totalorder %s4575_s9, %s3156_s7  ;;  %s3299_s8 = smov [#allocation8]  }
  0x99   : > { %467 = vadd.xlane.f32.xlu0 %v466_v16  ;;  %v3690_v46 = vld [vmem:[%s3555_s13 + $0x100] sm:$0xff]  ;;  %v3693_v47 = vld [vmem:[%s3555_s13 + $0x108] sm:$0xff]  ;;  %v496_v48 = vadd.f32 %v3677_v41, %v3674_v40  ;;  %v3698_v49 = vld [vmem:[%s3555_s13 + $0x110] sm:$0xff]  ;;  %v499_v51 = vadd.f32 %v3687_v45, %v3684_v44 }
  0x9a   : > { %v3701_v50 = vld [vmem:[%s3555_s13 + $0x118] sm:$0xff]  ;;  %v3706_v52 = vld [vmem:[%s3555_s13 + $0x120] sm:$0xff]  ;;  %v3709_v53 = vld [vmem:[%s3555_s13 + $0x128] sm:$0xff]  ;;  %v502_v54 = vadd.f32 %v3693_v47, %v3690_v46  ;;  %p3158_p10 = pnand %p3157_p2, %p3490_p6 }
  0x9b   : > { %470 = vadd.xlane.f32.xlu1 %v469_v17  ;;  %v505_v55 = vadd.f32 %v3701_v50, %v3698_v49  ;;  %v3716_v56 = vld [vmem:[%s3555_s13 + $0x130] sm:$0xff]  ;;  %v3719_v57 = vld [vmem:[%s3555_s13 + $0x138] sm:$0xff]  ;;  %v3722_v58 = vld [vmem:[%s3555_s13 + $0x140] sm:$0xff]  ;;  %v508_v60 = vadd.f32 %v3709_v53, %v3706_v52 }
  0x9c   : > { %v3725_v59 = vld [vmem:[%s3555_s13 + $0x148] sm:$0xff]  ;;  %v511_v61 = vadd.f32 %v3719_v57, %v3716_v56  ;;  %v3732_v62 = vld [vmem:[%s3555_s13 + $0x150] sm:$0xff]  ;;  %v3735_v63 = vld [vmem:[%s3555_s13 + $0x158] sm:$0xff]  ;;  %p3159_p4 = pneg %p3158_p10 }
  0x9d   : > { %473 = vadd.xlane.f32.xlu0 %v472_v22  ;;  %v514_v3 = vadd.f32 %v3725_v59, %v3722_v58  ;;  %v517_v7 = vadd.f32 %v3735_v63, %v3732_v62  ;;  %v2910_v10 = vld [vmem:[#allocation5 + $0x4] ss:$8 sps:$4 sm:$0xff]   ;;  %v2914_v16 = vld [vmem:[#allocation5] ss:$8 sps:$4 sm:$0xff]   ;;  %v2916_v22 = vld [vmem:[#allocation5 + $0x14] ss:$8 sps:$4 sm:$0xff]  }
  0x9e   : > { %v2912_v11 = vld [vmem:[#allocation7 + $0x4] ss:$8 sps:$4 sm:$0xff]   ;;  %v2915_v17 = vld [vmem:[#allocation7] ss:$8 sps:$4 sm:$0xff]   ;;  %1353 = vmatprep.subr.bf16.mxu0 %v2910_v10  ;;  %v2940_v10 = vld [vmem:[#allocation5 + $0x54] ss:$8 sps:$4 sm:$0xff]  }
  0x9f   : > { %476 = vadd.xlane.f32.xlu1 %v475_v23  ;;  %v2918_v23 = vld [vmem:[#allocation7 + $0x14] ss:$8 sps:$4 sm:$0xff]   ;;  %1750 = vmatprep.subr.bf16.mxu1 %v2912_v11 }
  0xa0   : > { %1354 = vmatpush1.bf16.msra.mxu0 %v2914_v16  ;;  %1751 = vmatpush1.bf16.msra.mxu1 %v2915_v17  ;;  %v2942_v11 = vld [vmem:[#allocation7 + $0x54] ss:$8 sps:$4 sm:$0xff]   ;;  %v2944_v16 = vld [vmem:[#allocation5 + $0x50] ss:$8 sps:$4 sm:$0xff]  }
  0xa1   : > { %479 = vadd.xlane.f32.xlu0 %v478_v30  ;;  %v2920_v30 = vld [vmem:[#allocation5 + $0x10] ss:$8 sps:$4 sm:$0xff]   ;;  %1355 = vmatprep.subr.bf16.mxu0 %v2916_v22  ;;  %v2946_v22 = vld [vmem:[#allocation5 + $0x64] ss:$8 sps:$4 sm:$0xff]  }
  0xa2   : > { %1752 = vmatprep.subr.bf16.mxu1 %v2918_v23  ;;  %v2945_v17 = vld [vmem:[#allocation7 + $0x50] ss:$8 sps:$4 sm:$0xff]   ;;  %v2948_v23 = vld [vmem:[#allocation7 + $0x64] ss:$8 sps:$4 sm:$0xff]  }
  0xa3   : > { %482 = vadd.xlane.f32.xlu1 %v481_v33  ;;  %v2921_v33 = vld [vmem:[#allocation7 + $0x10] ss:$8 sps:$4 sm:$0xff]  }
  0xa4   : > { %1356 = vmatpush1.bf16.msra.mxu0 %v2920_v30  ;;  %1753 = vmatpush1.bf16.msra.mxu1 %v2921_v33  ;;  %v2950_v30 = vld [vmem:[#allocation5 + $0x60] ss:$8 sps:$4 sm:$0xff]  }
  0xa5   : > { %485 = vadd.xlane.f32.xlu0 %v484_v36  ;;  %v2922_v36 = vld [vmem:[#allocation5 + $0x24] ss:$8 sps:$4 sm:$0xff]   ;;  %v2951_v33 = vld [vmem:[#allocation7 + $0x60] ss:$8 sps:$4 sm:$0xff]  }
  0xa6   : > { %1357 = vmatprep.subr.bf16.mxu0 %v2922_v36  ;;  %v2952_v36 = vld [vmem:[#allocation5 + $0x74] ss:$8 sps:$4 sm:$0xff]  }
  0xa7   : > { %488 = vadd.xlane.f32.xlu1 %v487_v39  ;;  %v2924_v39 = vld [vmem:[#allocation7 + $0x24] ss:$8 sps:$4 sm:$0xff]  }
  0xa8   : > { %1754 = vmatprep.subr.bf16.mxu1 %v2924_v39  ;;  %v2954_v39 = vld [vmem:[#allocation7 + $0x74] ss:$8 sps:$4 sm:$0xff]  }
  0xa9   : > { %491 = vadd.xlane.f32.xlu0 %v490_v42  ;;  %v2926_v42 = vld [vmem:[#allocation5 + $0x20] ss:$8 sps:$4 sm:$0xff]  }
  0xaa   : > { %1358 = vmatpush1.bf16.msra.mxu0 %v2926_v42  ;;  %v2956_v42 = vld [vmem:[#allocation5 + $0x70] ss:$8 sps:$4 sm:$0xff]  }
  0xab   : > { %494 = vadd.xlane.f32.xlu1 %v493_v43  ;;  %v2927_v43 = vld [vmem:[#allocation7 + $0x20] ss:$8 sps:$4 sm:$0xff]  }
  0xac   : > { %1755 = vmatpush1.bf16.msra.mxu1 %v2927_v43  ;;  %v2957_v43 = vld [vmem:[#allocation7 + $0x70] ss:$8 sps:$4 sm:$0xff]  }
  0xad   : > { %497 = vadd.xlane.f32.xlu0 %v496_v48  ;;  %v2928_v48 = vld [vmem:[#allocation5 + $0x34] ss:$8 sps:$4 sm:$0xff]  }
  0xae   : > { %1359 = vmatprep.subr.bf16.mxu0 %v2928_v48  ;;  %v2958_v48 = vld [vmem:[#allocation5 + $0x84] ss:$8 sps:$4 sm:$0xff]  }
  0xaf   : > { %500 = vadd.xlane.f32.xlu1 %v499_v51  ;;  %v2930_v51 = vld [vmem:[#allocation7 + $0x34] ss:$8 sps:$4 sm:$0xff]  }
  0xb0   : > { %1756 = vmatprep.subr.bf16.mxu1 %v2930_v51  ;;  %v2960_v51 = vld [vmem:[#allocation7 + $0x84] ss:$8 sps:$4 sm:$0xff]  }
  0xb1   : > { %503 = vadd.xlane.f32.xlu0 %v502_v54  ;;  %v2932_v54 = vld [vmem:[#allocation5 + $0x30] ss:$8 sps:$4 sm:$0xff]  }
  0xb2   : > { %1360 = vmatpush1.bf16.msra.mxu0 %v2932_v54  ;;  %v2962_v54 = vld [vmem:[#allocation5 + $0x80] ss:$8 sps:$4 sm:$0xff]  }
  0xb3   : > { %506 = vadd.xlane.f32.xlu1 %v505_v55  ;;  %v2933_v55 = vld [vmem:[#allocation7 + $0x30] ss:$8 sps:$4 sm:$0xff]  }
  0xb4   : > { %1757 = vmatpush1.bf16.msra.mxu1 %v2933_v55  ;;  %v2963_v55 = vld [vmem:[#allocation7 + $0x80] ss:$8 sps:$4 sm:$0xff]  }
  0xb5   : > { %509 = vadd.xlane.f32.xlu0 %v508_v60  ;;  %v2934_v60 = vld [vmem:[#allocation5 + $0x44] ss:$8 sps:$4 sm:$0xff]  }
  0xb6   : > { %1361 = vmatprep.subr.bf16.mxu0 %v2934_v60 }
  0xb7   : > { %512 = vadd.xlane.f32.xlu1 %v511_v61  ;;  %v2936_v61 = vld [vmem:[#allocation7 + $0x44] ss:$8 sps:$4 sm:$0xff]  }
  0xb8   : > { %1758 = vmatprep.subr.bf16.mxu1 %v2936_v61 }
  0xb9   : > { %515 = vadd.xlane.f32.xlu0 %v514_v3  ;;  %v2938_v3 = vld [vmem:[#allocation5 + $0x40] ss:$8 sps:$4 sm:$0xff]  }
  0xba   : > { %1362 = vmatpush1.bf16.msra.mxu0 %v2938_v3 }
  0xbb   : > { %518 = vadd.xlane.f32.xlu1 %v517_v7  ;;  %v2939_v7 = vld [vmem:[#allocation7 + $0x40] ss:$8 sps:$4 sm:$0xff]   ;;  %1363 = vmatprep.subr.bf16.mxu0 %v2940_v10 }
  0xbc   : > { %1759 = vmatpush1.bf16.msra.mxu1 %v2939_v7 }
  0xbd   : > { %1760 = vmatprep.subr.bf16.mxu1 %v2942_v11 }
  0xbe   : > { %1364 = vmatpush1.bf16.msra.mxu0 %v2944_v16 }
  0xbf   : > { %1365 = vmatprep.subr.bf16.mxu0 %v2946_v22 }
  0xc0   : > { %1761 = vmatpush1.bf16.msra.mxu1 %v2945_v17 }
  0xc1   : > { %1762 = vmatprep.subr.bf16.mxu1 %v2948_v23 }
  0xc2   : > { %1366 = vmatpush1.bf16.msra.mxu0 %v2950_v30 }
  0xc3   : > { %1367 = vmatprep.subr.bf16.mxu0 %v2952_v36 }
  0xc4   : > { %1763 = vmatpush1.bf16.msra.mxu1 %v2951_v33 }
  0xc5   : > { %1764 = vmatprep.subr.bf16.mxu1 %v2954_v39 }
  0xc6   : > { %1368 = vmatpush1.bf16.msra.mxu0 %v2956_v42 }
  0xc7   : > { %1369 = vmatprep.subr.bf16.mxu0 %v2958_v48 }
  0xc8   : > { %1765 = vmatpush1.bf16.msra.mxu1 %v2957_v43 }
  0xc9   : > { %1766 = vmatprep.subr.bf16.mxu1 %v2960_v51 }
  0xca   : > { %1370 = vmatpush1.bf16.msra.mxu0 %v2962_v54 }
  0xcc   : > { %1767 = vmatpush1.bf16.msra.mxu1 %v2963_v55 }
 0x11e   : > { %v456_v60 = vpop.xlane.xlu0 %455 }
 0x11f   : > { %v551_v61 = vmul.f32 0.00390625, %v456_v60 }
 0x120   : > { %v462_v3 = vpop.xlane.xlu1 %461 }
 0x121   : > { %v553_v7 = vmul.f32 0.00390625, %v462_v3  ;;  %v3742_v10 = vsub.f32 %v3566_v0, %v551_v61  ;;  %v3745_v11 = vsub.f32 %v3569_v1, %v551_v61  ;;  %v3758_v0 = vld [vmem:[%s3555_s13 + $0x160] sm:$0xff]  ;;  %v3761_v1 = vld [vmem:[%s3555_s13 + $0x168] sm:$0xff]  ;;  %v3786_v61 = vld [vmem:[%s3555_s13 + $0x170] sm:$0xff] }
 0x122   : > { %v459_v16 = vpop.xlane.xlu0 %458  ;;  %v520_v48 = vadd.f32 %v3761_v1, %v3758_v0  ;;  %v3789_v3 = vld [vmem:[%s3555_s13 + $0x178] sm:$0xff] }
 0x123   : > { %v3748_v17 = vsub.f32 %v3580_v5, %v553_v7  ;;  %v3751_v22 = vsub.f32 %v3583_v6, %v553_v7  ;;  %v552_v23 = vmul.f32 0.00390625, %v459_v16  ;;  %v647_v30 = vmul.f32 %v3742_v10, %v3742_v10 }
 0x124   : > { %v648_v33 = vmul.f32 %v3745_v11, %v3745_v11  ;;  %v465_v36 = vpop.xlane.xlu1 %464 }
 0x125   : > { %4754 = vst [vmem:[#allocation21_spill] sm:$0xff] %v3748_v17  ;;  %4755 = vst [vmem:[#allocation22_spill] sm:$0xff] %v3751_v22  ;;  %v554_v39 = vmul.f32 0.00390625, %v465_v36  ;;  %v3764_v5 = vsub.f32 %v3572_v2, %v552_v23  ;;  %v3767_v6 = vsub.f32 %v3577_v4, %v552_v23  ;;  %v651_v54 = vmul.f32 %v3748_v17, %v3748_v17 }
 0x126   : > { %v711_v42 = vadd.f32 %v648_v33, %v647_v30  ;;  %v468_v51 = vpop.xlane.xlu0 %467  ;;  %v652_v55 = vmul.f32 %v3751_v22, %v3751_v22  ;;  %v2966_v22 = vld [vmem:[#allocation7 + $0x94] ss:$8 sps:$4 sm:$0xff]  }
 0x127   : > { %4756 = vst [vmem:[#allocation23_spill] sm:$0xff] %v3764_v5  ;;  %4757 = vst [vmem:[#allocation24_spill] sm:$0xff] %v3767_v6  ;;  %v3770_v43 = vsub.f32 %v3588_v8, %v554_v39  ;;  %v3779_v2 = vsub.f32 %v3591_v9, %v554_v39  ;;  %v649_v4 = vmul.f32 %v3764_v5, %v3764_v5  ;;  %v555_v60 = vmul.f32 0.00390625, %v468_v51  ;;  %v3802_v51 = vld [vmem:[%s3555_s13 + $0x180] sm:$0xff]  ;;  %v2969_v5 = vld [vmem:[#allocation7 + $0x90] ss:$8 sps:$4 sm:$0xff]  }
 0x128   : > { %712 = vadd.xlane.f32.xlu0 %v711_v42  ;;  %v650_v8 = vmul.f32 %v3767_v6, %v3767_v6  ;;  %v471_v7 = vpop.xlane.xlu1 %470  ;;  %v717_v23 = vadd.f32 %v652_v55, %v651_v54  ;;  %v523_v9 = vadd.f32 %v3789_v3, %v3786_v61  ;;  %v3805_v54 = vld [vmem:[%s3555_s13 + $0x188] sm:$0xff]  ;;  %1768 = vmatprep.subr.bf16.mxu1 %v2966_v22 }
 0x129   : > { %4758 = vst [vmem:[#allocation25_spill] sm:$0xff] %v3770_v43  ;;  %4759 = vst [vmem:[#allocation26_spill] sm:$0xff] %v3779_v2  ;;  %v556_v30 = vmul.f32 0.00390625, %v471_v7  ;;  %v653_v33 = vmul.f32 %v3770_v43, %v3770_v43  ;;  %v3796_v39 = vsub.f32 %v3598_v12, %v555_v60  ;;  %v3799_v42 = vsub.f32 %v3601_v13, %v555_v60  ;;  %v3821_v43 = vld [vmem:[%s3555_s13 + $0x198] sm:$0xff]  ;;  %v2972_v22 = vld [vmem:[#allocation7 + $0xa4] ss:$8 sps:$4 sm:$0xff]  }
 0x12a   : > { %v714_v16 = vadd.f32 %v650_v8, %v649_v4  ;;  %v474_v36 = vpop.xlane.xlu0 %473  ;;  %v654_v55 = vmul.f32 %v3779_v2, %v3779_v2  ;;  %v526_v12 = vadd.f32 %v3805_v54, %v3802_v51  ;;  %1769 = vmatpush1.bf16.msra.mxu1 %v2969_v5 }
 0x12b   : > { %4760 = vst [vmem:[#allocation27_spill] sm:$0xff] %v3796_v39  ;;  %4761 = vst [vmem:[#allocation28_spill] sm:$0xff] %v3799_v42  ;;  %v3810_v8 = vsub.f32 %v3604_v14, %v556_v30  ;;  %v557_v7 = vmul.f32 0.00390625, %v474_v36  ;;  %v655_v14 = vmul.f32 %v3796_v39, %v3796_v39  ;;  %1770 = vmatprep.subr.bf16.mxu1 %v2972_v22  ;;  %v3881_v22 = vld [vmem:[%s3555_s13 + $0x1c8] sm:$0xff] }
 0x12c   : > { %521 = vadd.xlane.f32.xlu0 %v520_v48  ;;  %715 = vadd.xlane.f32.xlu1 %v714_v16  ;;  %v477_v4 = vpop.xlane.xlu1 %476  ;;  %v3813_v48 = vsub.f32 %v3607_v15, %v556_v30  ;;  %v720_v60 = vadd.f32 %v654_v55, %v653_v33  ;;  %v3818_v16 = vld [vmem:[%s3555_s13 + $0x190] sm:$0xff]  ;;  %v656_v15 = vmul.f32 %v3799_v42, %v3799_v42  ;;  %v3834_v33 = vld [vmem:[%s3555_s13 + $0x1a0] sm:$0xff]  ;;  %v3845_v42 = vld [vmem:[%s3555_s13 + $0x1a8] sm:$0xff] }
 0x12d   : > { %4762 = vst [vmem:[#allocation29_spill] sm:$0xff] %v3810_v8  ;;  %v529_v2 = vadd.f32 %v3821_v43, %v3818_v16  ;;  %v558_v17 = vmul.f32 0.00390625, %v477_v4  ;;  %v3839_v55 = vsub.f32 %v3614_v18, %v557_v7  ;;  %v3842_v39 = vsub.f32 %v3617_v19, %v557_v7  ;;  %4766 = vst [vmem:[#allocation33_spill] sm:$0xff] %v3845_v42 }
 0x12e   : > { %4763 = vst [vmem:[#allocation30_spill] sm:$0xff] %v3813_v48  ;;  %v480_v13 = vpop.xlane.xlu0 %479  ;;  %v723_v4 = vadd.f32 %v656_v15, %v655_v14  ;;  %v532_v19 = vadd.f32 %v3845_v42, %v3834_v33  ;;  %v2974_v42 = vld [vmem:[#allocation5 + $0xa0] ss:$8 sps:$4 sm:$0xff]  }
 0x12f   : > { %4764 = vst [vmem:[#allocation31_spill] sm:$0xff] %v3839_v55  ;;  %4765 = vst [vmem:[#allocation32_spill] sm:$0xff] %v3842_v39  ;;  %v3851_v18 = vsub.f32 %v3623_v21, %v558_v17  ;;  %v559_v14 = vmul.f32 0.00390625, %v480_v13  ;;  %v660_v21 = vmul.f32 %v3842_v39, %v3842_v39  ;;  %v2978_v39 = vld [vmem:[#allocation7 + $0xb4] ss:$8 sps:$4 sm:$0xff]  }
 0x130   : > { %718 = vadd.xlane.f32.xlu0 %v717_v23  ;;  %524 = vadd.xlane.f32.xlu1 %v523_v9  ;;  %v483_v30 = vpop.xlane.xlu1 %482  ;;  %v657_v23 = vmul.f32 %v3810_v8, %v3810_v8  ;;  %v658_v9 = vmul.f32 %v3813_v48, %v3813_v48  ;;  %v2964_v8 = vld [vmem:[#allocation5 + $0x94] ss:$8 sps:$4 sm:$0xff]   ;;  %v2968_v48 = vld [vmem:[#allocation5 + $0x90] ss:$8 sps:$4 sm:$0xff]  }
 0x131   : > { %1371 = vmatprep.subr.bf16.mxu0 %v2964_v8  ;;  %4768 = vst [vmem:[#allocation35_spill] sm:$0xff] %v3851_v18  ;;  %v3859_v8 = vld [vmem:[%s3555_s13 + $0x1b8] sm:$0xff] }
 0x132   : > { %v3836_v36 = vpop.xlane.xlu0 %485  ;;  %1372 = vmatpush1.bf16.msra.mxu0 %v2968_v48  ;;  %v726_v7 = vadd.f32 %v658_v9, %v657_v23  ;;  %4769 = vst [vmem:[#allocation36_spill] sm:$0xff] %v3859_v8  ;;  %v2975_v48 = vld [vmem:[#allocation7 + $0xa0] ss:$8 sps:$4 sm:$0xff]   ;;  %v662_v23 = vmul.f32 %v3851_v18, %v3851_v18  ;;  %v2980_v18 = vld [vmem:[#allocation5 + $0xb0] ss:$8 sps:$4 sm:$0xff]  }
 0x133   : > { %v3872_v9 = vld [vmem:[%s3555_s13 + $0x1c0] sm:$0xff]  ;;  %1771 = vmatpush1.bf16.msra.mxu1 %v2975_v48 }
 0x134   : > { %527 = vadd.xlane.f32.xlu0 %v526_v12  ;;  %721 = vadd.xlane.f32.xlu1 %v720_v60  ;;  %v489_v6 = vpop.xlane.xlu1 %488  ;;  %v3848_v12 = vsub.f32 %v3620_v20, %v558_v17  ;;  %v3856_v60 = vld [vmem:[%s3555_s13 + $0x1b0] sm:$0xff]  ;;  %v659_v20 = vmul.f32 %v3839_v55, %v3839_v55  ;;  %v2970_v17 = vld [vmem:[#allocation5 + $0xa4] ss:$8 sps:$4 sm:$0xff]  }
 0x135   : > { %1373 = vmatprep.subr.bf16.mxu0 %v2970_v17  ;;  %v535_v5 = vadd.f32 %v3859_v8, %v3856_v60  ;;  %v3878_v17 = vsub.f32 %v3633_v25, %v559_v14  ;;  %v2976_v55 = vld [vmem:[#allocation5 + $0xb4] ss:$8 sps:$4 sm:$0xff]   ;;  %v2981_v8 = vld [vmem:[#allocation7 + $0xb0] ss:$8 sps:$4 sm:$0xff]   ;;  %1772 = vmatprep.subr.bf16.mxu1 %v2978_v39  ;;  %v538_v25 = vadd.f32 %v3881_v22, %v3872_v9  ;;  %v562_v48 = vmul.f32 0.00390625, %v489_v6 }
 0x136   : > { %4767 = vst [vmem:[#allocation34_spill] sm:$0xff] %v3848_v12  ;;  %v492_v15 = vpop.xlane.xlu0 %491  ;;  %v661_v13 = vmul.f32 %v3848_v12, %v3848_v12  ;;  %1374 = vmatpush1.bf16.msra.mxu0 %v2974_v42  ;;  %v3896_v39 = vld [vmem:[%s3555_s13 + $0x1d8] sm:$0xff] }
 0x137   : > { %4771 = vst [vmem:[#allocation38_spill] sm:$0xff] %v3878_v17  ;;  %1375 = vmatprep.subr.bf16.mxu0 %v2976_v55  ;;  %1773 = vmatpush1.bf16.msra.mxu1 %v2981_v8  ;;  %v561_v55 = vmul.f32 0.00390625, %v3836_v36  ;;  %v2986_v8 = vld [vmem:[#allocation5 + $0xc0] ss:$8 sps:$4 sm:$0xff]  }
 0x138   : > { %530 = vadd.xlane.f32.xlu1 %v529_v2  ;;  %724 = vadd.xlane.f32.xlu0 %v723_v4  ;;  %v560_v2 = vmul.f32 0.00390625, %v483_v30  ;;  %v3875_v4 = vsub.f32 %v3630_v24, %v559_v14  ;;  %v729_v30 = vadd.f32 %v660_v21, %v659_v20  ;;  %v495_v12 = vpop.xlane.xlu1 %494  ;;  %v732_v14 = vadd.f32 %v662_v23, %v661_v13  ;;  %v2982_v20 = vld [vmem:[#allocation5 + $0xc4] ss:$8 sps:$4 sm:$0xff]  }
 0x139   : > { %v2984_v21 = vld [vmem:[#allocation7 + $0xc4] ss:$8 sps:$4 sm:$0xff]   ;;  %v3909_v6 = vsub.f32 %v3642_v28, %v561_v55  ;;  %v3924_v28 = vsub.f32 %v3653_v32, %v562_v48  ;;  %v3935_v32 = vld [vmem:[%s3555_s13 + $0x1f0] sm:$0xff] }
 0x13a   : > { %4770 = vst [vmem:[#allocation37_spill] sm:$0xff] %v3875_v4  ;;  %v3884_v42 = vsub.f32 %v3636_v26, %v560_v2  ;;  %v3887_v24 = vsub.f32 %v3639_v27, %v560_v2  ;;  %1376 = vmatpush1.bf16.msra.mxu0 %v2980_v18  ;;  %v663_v26 = vmul.f32 %v3875_v4, %v3875_v4  ;;  %v563_v2 = vmul.f32 0.00390625, %v492_v15  ;;  %v3918_v4 = vld [vmem:[%s3555_s13 + $0x1e8] sm:$0xff] }
 0x13b   : > { %v664_v27 = vmul.f32 %v3878_v17, %v3878_v17  ;;  %1377 = vmatprep.subr.bf16.mxu0 %v2982_v20  ;;  %1774 = vmatprep.subr.bf16.mxu1 %v2984_v21  ;;  %4773 = vst [vmem:[#allocation40_spill] sm:$0xff] %v3909_v6  ;;  %v3915_v21 = vld [vmem:[%s3555_s13 + $0x1e0] sm:$0xff]  ;;  %v2990_v17 = vld [vmem:[#allocation7 + $0xd4] ss:$8 sps:$4 sm:$0xff]   ;;  %4776 = vst [vmem:[#allocation43_spill] sm:$0xff] %v3924_v28 }
 0x13c   : > { %727 = vadd.xlane.f32.xlu1 %v726_v7  ;;  %533 = vadd.xlane.f32.xlu0 %v532_v19  ;;  %4772 = vst [vmem:[#allocation39_spill] sm:$0xff] %v3884_v42  ;;  %v3892_v19 = vld [vmem:[%s3555_s13 + $0x1d0] sm:$0xff]  ;;  %v498_v7 = vpop.xlane.xlu0 %497  ;;  %v501_v18 = vpop.xlane.xlu1 %500  ;;  %v665_v13 = vmul.f32 %v3884_v42, %v3884_v42  ;;  %v666_v23 = vmul.f32 %v3887_v24, %v3887_v24 }
 0x13d   : > { %v541_v36 = vadd.f32 %v3896_v39, %v3892_v19  ;;  %v735_v20 = vadd.f32 %v664_v27, %v663_v26  ;;  %v2988_v42 = vld [vmem:[#allocation5 + $0xd4] ss:$8 sps:$4 sm:$0xff]   ;;  %v3927_v26 = vsub.f32 %v3658_v34, %v563_v2  ;;  %v3930_v27 = vsub.f32 %v3661_v35, %v563_v2 }
 0x13e   : > { %1378 = vmatpush1.bf16.msra.mxu0 %v2986_v8  ;;  %v544_v8 = vadd.f32 %v3918_v4, %v3915_v21  ;;  %v3942_v35 = vld [vmem:[%s3555_s13 + $0x1f8] sm:$0xff]  ;;  %v566_v2 = vmul.f32 0.00390625, %v501_v18  ;;  %s2726_s13 = sshll.u32 %s4561_s5, 6  ;;  %s3160_s5 = sshll.u32 %s3299_s8, 4  ;;  %s3161_s5 = int_to_ptr.vmem [resolvable:$false] %s3160_s5 }
 0x13f   : > { %4777 = vst [vmem:[#allocation44_spill] sm:$0xff] %v3927_v26  ;;  %4778 = vst [vmem:[#allocation45_spill] sm:$0xff] %v3930_v27  ;;  %1379 = vmatprep.subr.bf16.mxu0 %v2988_v42  ;;  %v2996_v42 = vld [vmem:[#allocation7 + $0xe4] ss:$8 sps:$4 sm:$0xff]   ;;  %s4581_s18 = scalar_lea.hbm %s4819_s16, %s2726_s13  ;;  %s4588_s23 = scalar_lea.hbm %s4820_s14, %s2726_s13 }
 0x140   : > { %536 = vadd.xlane.f32.xlu1 %v535_v5  ;;  %730 = vadd.xlane.f32.xlu0 %v729_v30  ;;  %v2987_v5 = vld [vmem:[#allocation7 + $0xc0] ss:$8 sps:$4 sm:$0xff]   ;;  %v3912_v30 = vsub.f32 %v3645_v29, %v561_v55  ;;  %v504_v15 = vpop.xlane.xlu0 %503  ;;  %v2992_v29 = vld [vmem:[#allocation5 + $0xd0] ss:$8 sps:$4 sm:$0xff]   ;;  %s3162_s17 = scalar_lea.vmem %s3161_s5, 8192  ;;  %p3163_p8 = scmp.lt.s32.totalorder %s4575_s9, %s3161_s5 }
 0x141   : > { %1775 = vmatpush1.bf16.msra.mxu1 %v2987_v5  ;;  %v2993_v55 = vld [vmem:[#allocation7 + $0xd0] ss:$8 sps:$4 sm:$0xff]   ;;  %v565_v5 = vmul.f32 0.00390625, %v498_v7  ;;  %v2994_v7 = vld [vmem:[#allocation5 + $0xe4] ss:$8 sps:$4 sm:$0xff]   ;;  %p3164_p13 = scmp.lt.s32.totalorder %s3162_s17, %s3156_s7 }
 0x142   : > { %4774 = vst [vmem:[#allocation41_spill] sm:$0xff] %v3912_v30  ;;  %1776 = vmatprep.subr.bf16.mxu1 %v2990_v17  ;;  %v668_v34 = vmul.f32 %v3912_v30, %v3912_v30  ;;  %1380 = vmatpush1.bf16.msra.mxu0 %v2992_v29  ;;  %v671_v29 = vmul.f32 %v3927_v26, %v3927_v26  ;;  %v3000_v26 = vld [vmem:[#allocation5 + $0xf4] ss:$8 sps:$4 sm:$0xff]   ;;  %v3005_v30 = vld [vmem:[#allocation7 + $0xf0] ss:$8 sps:$4 sm:$0xff]  }
 0x143   : > { %v3955_v18 = vsub.f32 %v3674_v40, %v565_v5  ;;  %1381 = vmatprep.subr.bf16.mxu0 %v2994_v7  ;;  %v567_v40 = vmul.f32 0.00390625, %v504_v15  ;;  %v3970_v7 = vsub.f32 %v3687_v45, %v566_v2  ;;  %p3165_p3 = por %p3164_p13, %p3163_p8 }
 0x144   : > { %733 = vadd.xlane.f32.xlu1 %v732_v14  ;;  %539 = vadd.xlane.f32.xlu0 %v538_v25  ;;  %v3921_v14 = vsub.f32 %v3650_v31, %v562_v48  ;;  %v564_v25 = vmul.f32 0.00390625, %v495_v12  ;;  %v738_v31 = vadd.f32 %v666_v23, %v665_v13  ;;  %v667_v12 = vmul.f32 %v3909_v6, %v3909_v6  ;;  %v507_v48 = vpop.xlane.xlu1 %506  ;;  %v2999_v6 = vld [vmem:[#allocation7 + $0xe0] ss:$8 sps:$4 sm:$0xff]  }
 0x145   : > { %1777 = vmatpush1.bf16.msra.mxu1 %v2993_v55  ;;  %v670_v23 = vmul.f32 %v3924_v28, %v3924_v28  ;;  %v510_v55 = vpop.xlane.xlu0 %509  ;;  %v3967_v28 = vsub.f32 %v3684_v44, %v566_v2  ;;  %v3979_v45 = vsub.f32 %v3690_v46, %v567_v40  ;;  %p3166_p7 = pnand %p3165_p3, %p3159_p4 }
 0x146   : > { %4775 = vst [vmem:[#allocation42_spill] sm:$0xff] %v3921_v14  ;;  %v3945_v17 = vsub.f32 %v3666_v37, %v564_v25  ;;  %v669_v13 = vmul.f32 %v3921_v14, %v3921_v14  ;;  %v672_v37 = vmul.f32 %v3930_v27, %v3930_v27  ;;  %1778 = vmatprep.subr.bf16.mxu1 %v2996_v42  ;;  %v3002_v27 = vld [vmem:[#allocation7 + $0xf4] ss:$8 sps:$4 sm:$0xff]   ;;  %v3004_v42 = vld [vmem:[#allocation5 + $0xf0] ss:$8 sps:$4 sm:$0xff]   ;;  %v569_v15 = vmul.f32 0.00390625, %v510_v55 }
 0x147   : > { %v741_v14 = vadd.f32 %v668_v34, %v667_v12  ;;  %v3982_v34 = vsub.f32 %v3693_v47, %v567_v40  ;;  %v678_v47 = vmul.f32 %v3970_v7, %v3970_v7 }
 0x148   : > { %542 = vadd.xlane.f32.xlu1 %v541_v36  ;;  %736 = vadd.xlane.f32.xlu0 %v735_v20  ;;  %v3948_v36 = vsub.f32 %v3669_v38, %v564_v25  ;;  %v2998_v20 = vld [vmem:[#allocation5 + $0xe0] ss:$8 sps:$4 sm:$0xff]   ;;  %v3962_v38 = vsub.f32 %v3677_v41, %v565_v5  ;;  %v547_v25 = vadd.f32 %v3942_v35, %v3935_v32  ;;  %v513_v5 = vpop.xlane.xlu1 %512 }
 0x149   : > { %1382 = vmatpush1.bf16.msra.mxu0 %v2998_v20  ;;  %1779 = vmatpush1.bf16.msra.mxu1 %v2999_v6  ;;  %v673_v41 = vmul.f32 %v3945_v17, %v3945_v17  ;;  %v747_v12 = vadd.f32 %v672_v37, %v671_v29  ;;  %v675_v6 = vmul.f32 %v3955_v18, %v3955_v18  ;;  %v516_v2 = vpop.xlane.xlu0 %515  ;;  %v570_v46 = vmul.f32 0.00390625, %v513_v5 }
 0x14a   : > { %v674_v44 = vmul.f32 %v3948_v36, %v3948_v36  ;;  %1383 = vmatprep.subr.bf16.mxu0 %v3000_v26  ;;  %1780 = vmatprep.subr.bf16.mxu1 %v3002_v27  ;;  %v3997_v27 = vsub.f32 %v3706_v52, %v569_v15  ;;  %v571_v29 = vmul.f32 0.00390625, %v516_v2 }
 0x14b   : > { %v4007_v55 = vsub.f32 %v3716_v56, %v570_v46  ;;  %v4014_v40 = vsub.f32 %v3719_v57, %v570_v46 }
 0x14c   : > { %739 = vadd.xlane.f32.xlu1 %v738_v31  ;;  %545 = vadd.xlane.f32.xlu0 %v544_v8  ;;  %v744_v31 = vadd.f32 %v670_v23, %v669_v13  ;;  %v568_v8 = vmul.f32 0.00390625, %v507_v48  ;;  %v676_v48 = vmul.f32 %v3962_v38, %v3962_v38  ;;  %v677_v13 = vmul.f32 %v3967_v28, %v3967_v28  ;;  %v519_v37 = vpop.xlane.xlu1 %518 }
 0x14d   : > { %1384 = vmatpush1.bf16.msra.mxu0 %v3004_v42  ;;  %1781 = vmatpush1.bf16.msra.mxu1 %v3005_v30  ;;  %v4000_v23 = vsub.f32 %v3709_v53, %v569_v15  ;;  %v750_v20 = vadd.f32 %v674_v44, %v673_v41  ;;  %v4021_v56 = vsub.f32 %v3722_v58, %v571_v29 }
 0x14e   : > { %v3989_v26 = vsub.f32 %v3698_v49, %v568_v8  ;;  %v753_v30 = vadd.f32 %v676_v48, %v675_v6  ;;  %v679_v49 = vmul.f32 %v3979_v45, %v3979_v45  ;;  %v756_v52 = vadd.f32 %v678_v47, %v677_v13 }
 0x14f   : > { %v684_v41 = vmul.f32 %v4000_v23, %v4000_v23  ;;  %v4024_v5 = vsub.f32 %v3725_v59, %v571_v29  ;;  %v685_v44 = vmul.f32 %v4007_v55, %v4007_v55  ;;  %v686_v6 = vmul.f32 %v4014_v40, %v4014_v40 }
 0x150   : > { %548 = vadd.xlane.f32.xlu1 %v547_v25  ;;  %742 = vadd.xlane.f32.xlu0 %v741_v14  ;;  %v3992_v14 = vsub.f32 %v3701_v50, %v568_v8  ;;  %v680_v50 = vmul.f32 %v3982_v34, %v3982_v34  ;;  %v681_v53 = vmul.f32 %v3989_v26, %v3989_v26 }
 0x151   : > { %v683_v8 = vmul.f32 %v3997_v27, %v3997_v27  ;;  %v687_v59 = vmul.f32 %v4021_v56, %v4021_v56  ;;  %v688_v48 = vmul.f32 %v4024_v5, %v4024_v5 }
 0x152   : > { %v682_v25 = vmul.f32 %v3992_v14, %v3992_v14  ;;  %v759_v42 = vadd.f32 %v680_v50, %v679_v49 }
 0x153   : > { %v765_v15 = vadd.f32 %v684_v41, %v683_v8  ;;  %v771_v2 = vadd.f32 %v688_v48, %v687_v59 }
 0x154   : > { %745 = vadd.xlane.f32.xlu1 %v744_v31  ;;  %748 = vadd.xlane.f32.xlu0 %v747_v12  ;;  %v572_v31 = vmul.f32 0.00390625, %v519_v37  ;;  %v762_v12 = vadd.f32 %v682_v25, %v681_v53 }
 0x156   : > { %v4027_v57 = vsub.f32 %v3732_v62, %v572_v31  ;;  %v4034_v58 = vsub.f32 %v3735_v63, %v572_v31  ;;  %v768_v62 = vadd.f32 %v686_v6, %v685_v44 }
 0x158   : > { %751 = vadd.xlane.f32.xlu1 %v750_v20  ;;  %754 = vadd.xlane.f32.xlu0 %v753_v30  ;;  %v689_v13 = vmul.f32 %v4027_v57, %v4027_v57  ;;  %v690_v46 = vmul.f32 %v4034_v58, %v4034_v58  ;;  %v968_v30 = vlaneseq }
 0x15a   : > { %v774_v63 = vadd.f32 %v690_v46, %v689_v13  ;;  %v969_v53 = vshrl.u32 %v968_v30, 7 }
 0x15c   : > { %757 = vadd.xlane.f32.xlu1 %v756_v52  ;;  %760 = vadd.xlane.f32.xlu0 %v759_v42  ;;  %v4054_v59 = vsub.s32 1, %v969_v53 }
 0x15e   : > { %4779 = vst [vmem:[#allocation46_spill] sm:$0xff] %v4054_v59 }
 0x160   : > { %763 = vadd.xlane.f32.xlu1 %v762_v12  ;;  %766 = vadd.xlane.f32.xlu0 %v765_v15 }
 0x164   : > { %769 = vadd.xlane.f32.xlu1 %v768_v62  ;;  %772 = vadd.xlane.f32.xlu0 %v771_v2  ;;  %v452_v62 = vld [vmem:[%s4677_s1] sm:$0x3]  ;;  %v4065_v2 = vsub.s32 0, %v969_v53 }
 0x165   : > { %v4072_v30 = vrot.slane %v452_v62, %v4054_v59 }
 0x166   : > { %4780 = vst [vmem:[#allocation47_spill] sm:$0xff] %v4065_v2  ;;  %v4084_v53 = vrot.slane %v452_v62, %v4065_v2 }
 0x168   : > { %775 = vadd.xlane.f32.xlu1 %v774_v63 }
 0x1b5   : > { %v713_v47 = vpop.xlane.xlu0 %712 }
 0x1b6   : > { %v807_v20 = vmul.f32 0.00390625, %v713_v47 }
 0x1b8   : > { %v839_v29 = vadd.f32 1e-05, %v807_v20 }
 0x1b9   : > { %v716_v49 = vpop.xlane.xlu1 %715  ;;  %v522_v50 = vpop.xlane.xlu0 %521 }
 0x1ba   : > { %3006 = vrsqrt.f32 %v839_v29  ;;  %v808_v37 = vmul.f32 0.00390625, %v716_v49  ;;  %v573_v52 = vmul.f32 0.00390625, %v522_v50 }
 0x1bc   : > { %v840_v25 = vadd.f32 1e-05, %v808_v37  ;;  %v4045_v31 = vsub.f32 %v3758_v0, %v573_v52  ;;  %v4048_v8 = vsub.f32 %v3761_v1, %v573_v52  ;;  %v453_v52 = vld [vmem:[%s4678_s2] sm:$0x3] }
 0x1bd   : > { %v525_v41 = vpop.xlane.xlu1 %524  ;;  %v719_v42 = vpop.xlane.xlu0 %718  ;;  %v4094_v62 = vrot.slane %v453_v52, %v4065_v2 }
 0x1be   : > { %3008 = vrsqrt.f32 %v840_v25  ;;  %v574_v12 = vmul.f32 0.00390625, %v525_v41  ;;  %v809_v15 = vmul.f32 0.00390625, %v719_v42  ;;  %v691_v44 = vmul.f32 %v4045_v31, %v4045_v31 }
 0x1bf   : > { %v692_v6 = vmul.f32 %v4048_v8, %v4048_v8 }
 0x1c0   : > { %v4057_v48 = vsub.f32 %v3786_v61, %v574_v12  ;;  %v4060_v0 = vsub.f32 %v3789_v3, %v574_v12  ;;  %v841_v1 = vadd.f32 1e-05, %v809_v15 }
 0x1c1   : > { %v722_v13 = vpop.xlane.xlu1 %721  ;;  %v528_v46 = vpop.xlane.xlu0 %527  ;;  %v777_v63 = vadd.f32 %v692_v6, %v691_v44 }
 0x1c2   : > { %3010 = vrsqrt.f32 %v841_v1  ;;  %v810_v47 = vmul.f32 0.00390625, %v722_v13  ;;  %v575_v20 = vmul.f32 0.00390625, %v528_v46  ;;  %v693_v61 = vmul.f32 %v4057_v48, %v4057_v48 }
 0x1c3   : > { %778 = vadd.xlane.f32.xlu0 %v777_v63  ;;  %v694_v3 = vmul.f32 %v4060_v0, %v4060_v0  ;;  %v4097_v13 = vrot.slane %v453_v52, %v4054_v59 }
 0x1c4   : > { %v3007_v29 = vpop.eup %3006  ;;  %v842_v49 = vadd.f32 1e-05, %v810_v47  ;;  %v4075_v50 = vsub.f32 %v3802_v51, %v575_v20  ;;  %v4078_v37 = vsub.f32 %v3805_v54, %v575_v20 }
 0x1c5   : > { %v531_v25 = vpop.xlane.xlu1 %530  ;;  %v725_v41 = vpop.xlane.xlu0 %724  ;;  %v780_v42 = vadd.f32 %v694_v3, %v693_v61  ;;  %v904_v12 = vmul.f32 %v3007_v29, %v3745_v11  ;;  %v903_v15 = vmul.f32 %v3007_v29, %v3742_v10  ;;  %v4781_v29 = vld [vmem:[#allocation24_spill] sm:$0xff] }
 0x1c6   : > { %3012 = vrsqrt.f32 %v842_v49  ;;  %v576_v51 = vmul.f32 0.00390625, %v531_v25  ;;  %v811_v44 = vmul.f32 0.00390625, %v725_v41  ;;  %v695_v54 = vmul.f32 %v4075_v50, %v4075_v50  ;;  %v4782_v25 = vld [vmem:[#allocation23_spill] sm:$0xff] }
 0x1c7   : > { %781 = vadd.xlane.f32.xlu1 %v780_v42  ;;  %v696_v6 = vmul.f32 %v4078_v37, %v4078_v37  ;;  %v979_v1 = vmul.f32 %v4072_v30, %v904_v12  ;;  %v978_v47 = vmul.f32 %v4084_v53, %v903_v15 }
 0x1c8   : > { %v3009_v11 = vpop.eup %3008  ;;  %v4100_v10 = vsub.f32 %v3818_v16, %v576_v51  ;;  %v4103_v46 = vsub.f32 %v3821_v43, %v576_v51  ;;  %v843_v63 = vadd.f32 1e-05, %v811_v44 }
 0x1c9   : > { %v728_v20 = vpop.xlane.xlu1 %727  ;;  %v534_v61 = vpop.xlane.xlu0 %533  ;;  %v783_v3 = vadd.f32 %v696_v6, %v695_v54  ;;  %v906_v49 = vmul.f32 %v3009_v11, %v4781_v29  ;;  %v905_v41 = vmul.f32 %v3009_v11, %v4782_v25  ;;  %v1054_v15 = vadd.f32 %v4097_v13, %v979_v1  ;;  %v4784_v11 = vld [vmem:[#allocation33_spill] sm:$0xff]  ;;  %v4785_v1 = vld [vmem:[#allocation22_spill] sm:$0xff] }
 0x1ca   : > { %3014 = vrsqrt.f32 %v843_v63  ;;  %v812_v52 = vmul.f32 0.00390625, %v728_v20  ;;  %v577_v42 = vmul.f32 0.00390625, %v534_v61  ;;  %v697_v16 = vmul.f32 %v4100_v10, %v4100_v10 }
 0x1cb   : > { %784 = vadd.xlane.f32.xlu0 %v783_v3  ;;  %v698_v43 = vmul.f32 %v4103_v46, %v4103_v46  ;;  %v981_v12 = vmul.f32 %v4072_v30, %v906_v49  ;;  %v980_v51 = vmul.f32 %v4084_v53, %v905_v41  ;;  %v1053_v20 = vadd.f32 %v4094_v62, %v978_v47 }
 0x1cc   : > { %v3011_v44 = vpop.eup %3010  ;;  %v844_v54 = vadd.f32 1e-05, %v812_v52  ;;  %v4116_v6 = vsub.f32 %v3834_v33, %v577_v42  ;;  %v4119_v63 = vsub.f32 %v4784_v11, %v577_v42 }
 0x1cd   : > { %v537_v61 = vpop.xlane.xlu1 %536  ;;  %v731_v3 = vpop.xlane.xlu0 %730  ;;  %v786_v29 = vadd.f32 %v698_v43, %v697_v16  ;;  %v1056_v25 = vadd.f32 %v4097_v13, %v981_v12  ;;  %v1055_v49 = vadd.f32 %v4094_v62, %v980_v51  ;;  %v908_v59 = vmul.f32 %v3011_v44, %v4785_v1  ;;  %v4786_v51 = vld [vmem:[#allocation36_spill] sm:$0xff] }
 0x1ce   : > { %4783 = vst [vmem:[#allocation24_spill] sm:$0xff] %v4116_v6  ;;  %3016 = vrsqrt.f32 %v844_v54  ;;  %v578_v41 = vmul.f32 0.00390625, %v537_v61  ;;  %v813_v52 = vmul.f32 0.00390625, %v731_v3  ;;  %v699_v33 = vmul.f32 %v4116_v6, %v4116_v6  ;;  %v4787_v61 = vld [vmem:[#allocation21_spill] sm:$0xff] }
 0x1cf   : > { %787 = vadd.xlane.f32.xlu1 %v786_v29  ;;  %v1118_v42 = vpack.c.bf16 %v1056_v25, %v1054_v15  ;;  %v1117_v11 = vpack.c.bf16 %v1055_v49, %v1053_v20  ;;  %v700_v47 = vmul.f32 %v4119_v63, %v4119_v63  ;;  %v983_v16 = vmul.f32 %v4072_v30, %v908_v59  ;;  %v4788_v29 = vld [vmem:[#allocation26_spill] sm:$0xff] }
 0x1d0   : > { %v3013_v43 = vpop.eup %3012  ;;  %v4131_v12 = vsub.f32 %v3856_v60, %v578_v41  ;;  %v4134_v1 = vsub.f32 %v4786_v51, %v578_v41  ;;  %v845_v54 = vadd.f32 1e-05, %v813_v52  ;;  %v907_v3 = vmul.f32 %v3011_v44, %v4787_v61  ;;  %v4789_v52 = vld [vmem:[#allocation25_spill] sm:$0xff] }
 0x1d1   : > { %v734_v2 = vpop.xlane.xlu1 %733  ;;  %1385 = vmatprep.mubr.bf16.mxu0 %v1118_v42  ;;  %1782 = vmatprep.mubr.bf16.mxu1 %v1118_v42  ;;  %v540_v15 = vpop.xlane.xlu0 %539  ;;  %v789_v20 = vadd.f32 %v700_v47, %v699_v33  ;;  %v910_v25 = vmul.f32 %v3013_v43, %v4788_v29  ;;  %v1058_v59 = vadd.f32 %v4097_v13, %v983_v16 }
 0x1d2   : > { %v814_v49 = vmul.f32 0.00390625, %v734_v2  ;;  %v579_v6 = vmul.f32 0.00390625, %v540_v15  ;;  %1386 = vmatmul.mubr.bf16.vlgmr.msra.gmra.mrb[0].mxu0 %v1117_v11  ;;  %1783 = vmatmul.mubr.bf16.vlgmr.msra.gmra.mrb[0].mxu1 %v1117_v11  ;;  %v701_v60 = vmul.f32 %v4131_v12, %v4131_v12  ;;  %v702_v44 = vmul.f32 %v4134_v1, %v4134_v1 }
 0x1d3   : > { %790 = vadd.xlane.f32.xlu0 %v789_v20  ;;  %v985_v41 = vmul.f32 %v4072_v30, %v910_v25  ;;  %v909_v42 = vmul.f32 %v3013_v43, %v4789_v52  ;;  %v982_v33 = vmul.f32 %v4084_v53, %v907_v3  ;;  %3018 = vrsqrt.f32 %v845_v54 }
 0x1d4   : > { %v3015_v47 = vpop.eup %3014  ;;  %v846_v2 = vadd.f32 1e-05, %v814_v49  ;;  %v4147_v11 = vsub.f32 %v3872_v9, %v579_v6  ;;  %v4150_v51 = vsub.f32 %v3881_v22, %v579_v6  ;;  %v792_v15 = vadd.f32 %v702_v44, %v701_v60  ;;  %v4791_v49 = vld [vmem:[#allocation28_spill] sm:$0xff] }
 0x1d5   : > { %v543_v16 = vpop.xlane.xlu1 %542  ;;  %v737_v61 = vpop.xlane.xlu0 %736  ;;  %v1060_v20 = vadd.f32 %v4097_v13, %v985_v41  ;;  %v984_v29 = vmul.f32 %v4084_v53, %v909_v42  ;;  %v1057_v43 = vadd.f32 %v4094_v62, %v982_v33  ;;  %v912_v60 = vmul.f32 %v3015_v47, %v4791_v49  ;;  %v4792_v33 = vld [vmem:[#allocation27_spill] sm:$0xff] }
 0x1d6   : > { %4790 = vst [vmem:[#allocation23_spill] sm:$0xff] %v4147_v11  ;;  %3020 = vrsqrt.f32 %v846_v2  ;;  %v580_v3 = vmul.f32 0.00390625, %v543_v16  ;;  %v815_v25 = vmul.f32 0.00390625, %v737_v61  ;;  %v703_v54 = vmul.f32 %v4147_v11, %v4147_v11  ;;  %793 = vadd.xlane.f32.xlu1 %v792_v15 }
 0x1d7   : > { %v1120_v9 = vpack.c.bf16 %v1060_v20, %v1058_v59  ;;  %v1059_v22 = vadd.f32 %v4094_v62, %v984_v29  ;;  %v704_v6 = vmul.f32 %v4150_v51, %v4150_v51  ;;  %v911_v2 = vmul.f32 %v3015_v47, %v4792_v33  ;;  %v4793_v20 = vld [vmem:[#allocation30_spill] sm:$0xff] }
 0x1d8   : > { %v3017_v44 = vpop.eup %3016  ;;  %v4162_v41 = vsub.f32 %v3892_v19, %v580_v3  ;;  %v4165_v52 = vsub.f32 %v3896_v39, %v580_v3  ;;  %v847_v42 = vadd.f32 1e-05, %v815_v25  ;;  %v987_v47 = vmul.f32 %v4072_v30, %v912_v60 }
 0x1d9   : > { %v740_v16 = vpop.xlane.xlu1 %739  ;;  %1395 = vmatprep.mubr.bf16.mxu0 %v1120_v9  ;;  %1792 = vmatprep.mubr.bf16.mxu1 %v1120_v9  ;;  %v546_v59 = vpop.xlane.xlu0 %545  ;;  %v1119_v61 = vpack.c.bf16 %v1059_v22, %v1057_v43  ;;  %v795_v15 = vadd.f32 %v704_v6, %v703_v54  ;;  %v914_v29 = vmul.f32 %v3017_v44, %v4793_v20  ;;  %v4794_v9 = vld [vmem:[#allocation29_spill] sm:$0xff] }
 0x1da   : > { %3022 = vrsqrt.f32 %v847_v42  ;;  %v816_v49 = vmul.f32 0.00390625, %v740_v16  ;;  %v581_v11 = vmul.f32 0.00390625, %v546_v59  ;;  %v705_v19 = vmul.f32 %v4162_v41, %v4162_v41 }
 0x1db   : > { %1396 = vmatmul.mubr.bf16.gmra.mrb[4].mxu0 %v1119_v61  ;;  %1793 = vmatmul.mubr.bf16.gmra.mrb[4].mxu1 %v1119_v61  ;;  %v706_v39 = vmul.f32 %v4165_v52, %v4165_v52  ;;  %v989_v3 = vmul.f32 %v4072_v30, %v914_v29  ;;  %v913_v22 = vmul.f32 %v3017_v44, %v4794_v9 }
 0x1dc   : > { %v848_v25 = vadd.f32 1e-05, %v816_v49  ;;  %v4176_v43 = vsub.f32 %v3915_v21, %v581_v11  ;;  %v4179_v54 = vsub.f32 %v3918_v4, %v581_v11  ;;  %796 = vadd.xlane.f32.xlu0 %v795_v15  ;;  %v1062_v16 = vadd.f32 %v4097_v13, %v987_v47 }
 0x1dd   : > { %v549_v6 = vpop.xlane.xlu1 %548  ;;  %v743_v42 = vpop.xlane.xlu0 %742  ;;  %v798_v33 = vadd.f32 %v706_v39, %v705_v19  ;;  %v1064_v59 = vadd.f32 %v4097_v13, %v989_v3  ;;  %v986_v60 = vmul.f32 %v4084_v53, %v911_v2  ;;  %v988_v29 = vmul.f32 %v4084_v53, %v913_v22  ;;  %v4797_v22 = vld [vmem:[#allocation32_spill] sm:$0xff] }
 0x1de   : > { %v3019_v61 = vpop.eup %3018  ;;  %3024 = vrsqrt.f32 %v848_v25  ;;  %v582_v20 = vmul.f32 0.00390625, %v549_v6  ;;  %v817_v21 = vmul.f32 0.00390625, %v743_v42  ;;  %v707_v44 = vmul.f32 %v4176_v43, %v4176_v43  ;;  %v4798_v42 = vld [vmem:[#allocation35_spill] sm:$0xff] }
 0x1df   : > { %799 = vadd.xlane.f32.xlu1 %v798_v33  ;;  %v1122_v4 = vpack.c.bf16 %v1064_v59, %v1062_v16  ;;  %v1061_v11 = vadd.f32 %v4094_v62, %v986_v60  ;;  %v708_v15 = vmul.f32 %v4179_v54, %v4179_v54  ;;  %v1063_v47 = vadd.f32 %v4094_v62, %v988_v29 }
 0x1e0   : > { %v3021_v49 = vpop.eup %3020  ;;  %v4192_v19 = vsub.f32 %v3935_v32, %v582_v20  ;;  %v4195_v2 = vsub.f32 %v3942_v35, %v582_v20  ;;  %v849_v39 = vadd.f32 1e-05, %v817_v21  ;;  %v916_v6 = vmul.f32 %v3019_v61, %v4797_v22 }
 0x1e1   : > { %v746_v3 = vpop.xlane.xlu1 %745  ;;  %1405 = vmatprep.mubr.bf16.mxu0 %v1122_v4  ;;  %1802 = vmatprep.mubr.bf16.mxu1 %v1122_v4  ;;  %v749_v25 = vpop.xlane.xlu0 %748  ;;  %v801_v9 = vadd.f32 %v708_v15, %v707_v44  ;;  %v918_v33 = vmul.f32 %v3021_v49, %v4798_v42  ;;  %v1121_v32 = vpack.c.bf16 %v1063_v47, %v1061_v11  ;;  %v4799_v15 = vld [vmem:[#allocation31_spill] sm:$0xff] }
 0x1e2   : > { %4795 = vst [vmem:[#allocation33_spill] sm:$0xff] %v4192_v19  ;;  %4796 = vst [vmem:[#allocation22_spill] sm:$0xff] %v4195_v2  ;;  %3026 = vrsqrt.f32 %v849_v39  ;;  %v818_v16 = vmul.f32 0.00390625, %v746_v3  ;;  %v819_v59 = vmul.f32 0.00390625, %v749_v25  ;;  %v709_v35 = vmul.f32 %v4192_v19, %v4192_v19  ;;  %v4800_v3 = vld [vmem:[#allocation34_spill] sm:$0xff] }
 0x1e3   : > { %802 = vadd.xlane.f32.xlu0 %v801_v9  ;;  %v710_v60 = vmul.f32 %v4195_v2, %v4195_v2  ;;  %v991_v20 = vmul.f32 %v4072_v30, %v916_v6  ;;  %v993_v21 = vmul.f32 %v4072_v30, %v918_v33  ;;  %1406 = vmatmul.mubr.bf16.gmra.mrb[8].mxu0 %v1121_v32  ;;  %v4801_v19 = vld [vmem:[#allocation38_spill] sm:$0xff] }
 0x1e4   : > { %v3023_v29 = vpop.eup %3022  ;;  %v850_v4 = vadd.f32 1e-05, %v818_v16  ;;  %v851_v44 = vadd.f32 1e-05, %v819_v59  ;;  %1803 = vmatmul.mubr.bf16.gmra.mrb[8].mxu1 %v1121_v32  ;;  %v915_v39 = vmul.f32 %v3019_v61, %v4799_v15  ;;  %v917_v11 = vmul.f32 %v3021_v49, %v4800_v3 }
 0x1e5   : > { %v752_v47 = vpop.xlane.xlu1 %751  ;;  %v755_v25 = vpop.xlane.xlu0 %754  ;;  %v804_v9 = vadd.f32 %v710_v60, %v709_v35  ;;  %v1066_v22 = vadd.f32 %v4097_v13, %v991_v20  ;;  %v1068_v42 = vadd.f32 %v4097_v13, %v993_v21  ;;  %v920_v6 = vmul.f32 %v3023_v29, %v4801_v19  ;;  %v4802_v60 = vld [vmem:[#allocation37_spill] sm:$0xff] }
 0x1e6   : > { %3028 = vrsqrt.f32 %v850_v4  ;;  %v820_v33 = vmul.f32 0.00390625, %v752_v47  ;;  %v821_v2 = vmul.f32 0.00390625, %v755_v25  ;;  %v990_v16 = vmul.f32 %v4084_v53, %v915_v39 }
 0x1e7   : > { %3030 = vrsqrt.f32 %v851_v44  ;;  %805 = vadd.xlane.f32.xlu1 %v804_v9  ;;  %v1124_v59 = vpack.c.bf16 %v1068_v42, %v1066_v22  ;;  %v992_v61 = vmul.f32 %v4084_v53, %v917_v11  ;;  %v995_v35 = vmul.f32 %v4072_v30, %v920_v6  ;;  %v4803_v11 = vld [vmem:[#allocation39_spill] sm:$0xff] }
 0x1e8   : > { %v3025_v49 = vpop.eup %3024  ;;  %v852_v32 = vadd.f32 1e-05, %v820_v33  ;;  %v919_v20 = vmul.f32 %v3023_v29, %v4802_v60  ;;  %v853_v15 = vadd.f32 1e-05, %v821_v2  ;;  %v1065_v19 = vadd.f32 %v4094_v62, %v990_v16 }
 0x1e9   : > { %v758_v21 = vpop.xlane.xlu1 %757  ;;  %1415 = vmatprep.mubr.bf16.mxu0 %v1124_v59  ;;  %1812 = vmatprep.mubr.bf16.mxu1 %v1124_v59  ;;  %v1067_v4 = vadd.f32 %v4094_v62, %v992_v61  ;;  %v922_v44 = vmul.f32 %v3025_v49, %v3887_v24  ;;  %v761_v3 = vpop.xlane.xlu0 %760  ;;  %v921_v47 = vmul.f32 %v3025_v49, %v4803_v11  ;;  %v4804_v59 = vld [vmem:[#allocation41_spill] sm:$0xff] }
 0x1ea   : > { %3032 = vrsqrt.f32 %v852_v32  ;;  %v822_v39 = vmul.f32 0.00390625, %v758_v21  ;;  %v994_v29 = vmul.f32 %v4084_v53, %v919_v20  ;;  %v1070_v42 = vadd.f32 %v4097_v13, %v995_v35  ;;  %v4805_v21 = vld [vmem:[#allocation40_spill] sm:$0xff] }
 0x1eb   : > { %v1123_v25 = vpack.c.bf16 %v1067_v4, %v1065_v19  ;;  %v997_v9 = vmul.f32 %v4072_v30, %v922_v44  ;;  %v996_v6 = vmul.f32 %v4084_v53, %v921_v47  ;;  %3034 = vrsqrt.f32 %v853_v15 }
 0x1ec   : > { %v3027_v2 = vpop.eup %3026  ;;  %v854_v22 = vadd.f32 1e-05, %v822_v39  ;;  %v823_v33 = vmul.f32 0.00390625, %v761_v3  ;;  %v1069_v20 = vadd.f32 %v4094_v62, %v994_v29 }
 0x1ed   : > { %1416 = vmatmul.mubr.bf16.gmra.mrb[12].mxu0 %v1123_v25  ;;  %1813 = vmatmul.mubr.bf16.gmra.mrb[12].mxu1 %v1123_v25  ;;  %v764_v24 = vpop.xlane.xlu1 %763  ;;  %v1072_v16 = vadd.f32 %v4097_v13, %v997_v9  ;;  %v924_v61 = vmul.f32 %v3027_v2, %v4804_v59  ;;  %v1071_v32 = vadd.f32 %v4094_v62, %v996_v6  ;;  %v767_v3 = vpop.xlane.xlu0 %766  ;;  %v4806_v25 = vld [vmem:[#allocation43_spill] sm:$0xff] }
 0x1ee   : > { %3036 = vrsqrt.f32 %v854_v22  ;;  %v824_v49 = vmul.f32 0.00390625, %v764_v24  ;;  %v923_v35 = vmul.f32 %v3027_v2, %v4805_v21  ;;  %v855_v39 = vadd.f32 1e-05, %v823_v33  ;;  %v4807_v22 = vld [vmem:[#allocation42_spill] sm:$0xff] }
 0x1ef   : > { %v1126_v60 = vpack.c.bf16 %v1072_v16, %v1070_v42  ;;  %v999_v15 = vmul.f32 %v4072_v30, %v924_v61  ;;  %v1125_v47 = vpack.c.bf16 %v1071_v32, %v1069_v20  ;;  %v4808_v16 = vld [vmem:[#allocation45_spill] sm:$0xff]  ;;  %v825_v61 = vmul.f32 0.00390625, %v767_v3 }
 0x1f0   : > { %v3029_v19 = vpop.eup %3028  ;;  %v856_v4 = vadd.f32 1e-05, %v824_v49  ;;  %v998_v29 = vmul.f32 %v4084_v53, %v923_v35 }
 0x1f1   : > { %v3031_v44 = vpop.eup %3030  ;;  %v770_v11 = vpop.xlane.xlu1 %769  ;;  %1425 = vmatprep.mubr.bf16.mxu0 %v1126_v60  ;;  %1822 = vmatprep.mubr.bf16.mxu1 %v1126_v60  ;;  %v926_v9 = vmul.f32 %v3029_v19, %v4806_v25  ;;  %v925_v6 = vmul.f32 %v3029_v19, %v4807_v22  ;;  %v1074_v49 = vadd.f32 %v4097_v13, %v999_v15 }
 0x1f2   : > { %3038 = vrsqrt.f32 %v856_v4  ;;  %v826_v42 = vmul.f32 0.00390625, %v770_v11  ;;  %v928_v59 = vmul.f32 %v3031_v44, %v4808_v16  ;;  %v1073_v21 = vadd.f32 %v4094_v62, %v998_v29 }
 0x1f3   : > { %v1001_v2 = vmul.f32 %v4072_v30, %v926_v9  ;;  %v1000_v24 = vmul.f32 %v4084_v53, %v925_v6  ;;  %3040 = vrsqrt.f32 %v855_v39  ;;  %v4809_v9 = vld [vmem:[#allocation44_spill] sm:$0xff]  ;;  %v857_v6 = vadd.f32 1e-05, %v825_v61 }
 0x1f4   : > { %v3033_v33 = vpop.eup %3032  ;;  %v1003_v35 = vmul.f32 %v4072_v30, %v928_v59  ;;  %v858_v4 = vadd.f32 1e-05, %v826_v42  ;;  %v927_v22 = vmul.f32 %v3031_v44, %v4809_v9  ;;  %v773_v42 = vpop.xlane.xlu0 %772 }
 0x1f5   : > { %1426 = vmatmul.mubr.bf16.gmra.mrb[16].mxu0 %v1125_v47  ;;  %1823 = vmatmul.mubr.bf16.gmra.mrb[16].mxu1 %v1125_v47  ;;  %v1076_v32 = vadd.f32 %v4097_v13, %v1001_v2  ;;  %v1075_v60 = vadd.f32 %v4094_v62, %v1000_v24  ;;  %v930_v20 = vmul.f32 %v3033_v33, %v3948_v36  ;;  %v3035_v19 = vpop.eup %3034  ;;  %v776_v25 = vpop.xlane.xlu1 %775  ;;  %v827_v61 = vmul.f32 0.00390625, %v773_v42 }
 0x1f6   : > { %v929_v15 = vmul.f32 %v3033_v33, %v3945_v17  ;;  %v1078_v36 = vadd.f32 %v4097_v13, %v1003_v35  ;;  %v932_v24 = vmul.f32 %v3035_v19, %v3962_v38  ;;  %3042 = vrsqrt.f32 %v858_v4 }
 0x1f7   : > { %v1128_v11 = vpack.c.bf16 %v1076_v32, %v1074_v49  ;;  %v1005_v3 = vmul.f32 %v4072_v30, %v930_v20  ;;  %v1127_v47 = vpack.c.bf16 %v1075_v60, %v1073_v21  ;;  %v828_v16 = vmul.f32 0.00390625, %v776_v25 }
 0x1f8   : > { %v3037_v39 = vpop.eup %3036  ;;  %v1004_v59 = vmul.f32 %v4084_v53, %v929_v15  ;;  %3044 = vrsqrt.f32 %v857_v6  ;;  %v1002_v49 = vmul.f32 %v4084_v53, %v927_v22  ;;  %v859_v4 = vadd.f32 1e-05, %v827_v61 }
 0x1f9   : > { %1435 = vmatprep.mubr.bf16.mxu0 %v1128_v11  ;;  %1832 = vmatprep.mubr.bf16.mxu1 %v1128_v11  ;;  %v1080_v29 = vadd.f32 %v4097_v13, %v1005_v3  ;;  %v934_v2 = vmul.f32 %v3037_v39, %v3970_v7  ;;  %v1007_v7 = vmul.f32 %v4072_v30, %v932_v24  ;;  %v860_v38 = vadd.f32 1e-05, %v828_v16 }
 0x1fa   : > { %v1079_v60 = vadd.f32 %v4094_v62, %v1004_v59  ;;  %v933_v20 = vmul.f32 %v3037_v39, %v3967_v28  ;;  %v1077_v11 = vadd.f32 %v4094_v62, %v1002_v49  ;;  %v931_v3 = vmul.f32 %v3035_v19, %v3955_v18 }
 0x1fb   : > { %v1130_v17 = vpack.c.bf16 %v1080_v29, %v1078_v36  ;;  %v1009_v44 = vmul.f32 %v4072_v30, %v934_v2  ;;  %v1082_v15 = vadd.f32 %v4097_v13, %v1007_v7  ;;  %3046 = vrsqrt.f32 %v860_v38 }
 0x1fc   : > { %v3039_v33 = vpop.eup %3038  ;;  %v1008_v9 = vmul.f32 %v4084_v53, %v933_v20  ;;  %3048 = vrsqrt.f32 %v859_v4 }
 0x1fd   : > { %1436 = vmatmul.mubr.bf16.gmra.mrb[20].mxu0 %v1127_v47  ;;  %1833 = vmatmul.mubr.bf16.gmra.mrb[20].mxu1 %v1127_v47  ;;  %v3041_v32 = vpop.eup %3040  ;;  %v1084_v21 = vadd.f32 %v4097_v13, %v1009_v44  ;;  %v938_v35 = vmul.f32 %v3039_v33, %v3992_v14  ;;  %v1129_v47 = vpack.c.bf16 %v1079_v60, %v1077_v11 }
 0x1fe   : > { %1445 = vmatprep.mubr.bf16.mxu0 %v1130_v17  ;;  %1842 = vmatprep.mubr.bf16.mxu1 %v1130_v17  ;;  %v936_v25 = vmul.f32 %v3041_v32, %v3982_v34  ;;  %v1006_v14 = vmul.f32 %v4084_v53, %v931_v3  ;;  %v1083_v34 = vadd.f32 %v4094_v62, %v1008_v9 }
 0x1ff   : > { %v1132_v22 = vpack.c.bf16 %v1084_v21, %v1082_v15  ;;  %v1013_v28 = vmul.f32 %v4072_v30, %v938_v35  ;;  %v937_v6 = vmul.f32 %v3039_v33, %v3989_v26  ;;  %v935_v42 = vmul.f32 %v3041_v32, %v3979_v45 }
 0x200   : > { %v3043_v39 = vpop.eup %3042  ;;  %v1011_v18 = vmul.f32 %v4072_v30, %v936_v25  ;;  %v1081_v2 = vadd.f32 %v4094_v62, %v1006_v14 }
 0x201   : > { %v1088_v36 = vadd.f32 %v4097_v13, %v1013_v28  ;;  %v942_v29 = vmul.f32 %v3043_v39, %v4014_v40  ;;  %v1012_v59 = vmul.f32 %v4084_v53, %v937_v6  ;;  %v1010_v26 = vmul.f32 %v4084_v53, %v935_v42 }
 0x202   : > { %v3045_v19 = vpop.eup %3044  ;;  %v1086_v24 = vadd.f32 %v4097_v13, %v1011_v18  ;;  %v1131_v17 = vpack.c.bf16 %v1083_v34, %v1081_v2 }
 0x203   : > { %v940_v16 = vmul.f32 %v3045_v19, %v4000_v23  ;;  %v1017_v61 = vmul.f32 %v4072_v30, %v942_v29  ;;  %v1087_v33 = vadd.f32 %v4094_v62, %v1012_v59  ;;  %v941_v23 = vmul.f32 %v3043_v39, %v4007_v55 }
 0x204   : > { %v1134_v44 = vpack.c.bf16 %v1088_v36, %v1086_v24  ;;  %v1085_v38 = vadd.f32 %v4094_v62, %v1010_v26  ;;  %v939_v60 = vmul.f32 %v3045_v19, %v3997_v27 }
 0x205   : > { %1446 = vmatmul.mubr.bf16.gmra.mrb[24].mxu0 %v1129_v47  ;;  %1843 = vmatmul.mubr.bf16.gmra.mrb[24].mxu1 %v1129_v47  ;;  %v3047_v49 = vpop.eup %3046  ;;  %v1015_v40 = vmul.f32 %v4072_v30, %v940_v16  ;;  %v1092_v7 = vadd.f32 %v4097_v13, %v1017_v61  ;;  %v1016_v4 = vmul.f32 %v4084_v53, %v941_v23 }
 0x206   : > { %1455 = vmatprep.mubr.bf16.mxu0 %v1132_v22  ;;  %1852 = vmatprep.mubr.bf16.mxu1 %v1132_v22  ;;  %v3049_v45 = vpop.eup %3048  ;;  %v946_v32 = vmul.f32 %v3047_v49, %v4034_v58  ;;  %v1133_v35 = vpack.c.bf16 %v1087_v33, %v1085_v38  ;;  %v1014_v55 = vmul.f32 %v4084_v53, %v939_v60 }
 0x207   : > { %v1090_v20 = vadd.f32 %v4097_v13, %v1015_v40  ;;  %v944_v21 = vmul.f32 %v3049_v45, %v4024_v5  ;;  %v1091_v27 = vadd.f32 %v4094_v62, %v1016_v4  ;;  %v945_v15 = vmul.f32 %v3047_v49, %v4027_v57 }
 0x208   : > { %v1021_v3 = vmul.f32 %v4072_v30, %v946_v32  ;;  %v1089_v25 = vadd.f32 %v4094_v62, %v1014_v55  ;;  %v943_v47 = vmul.f32 %v3049_v45, %v4021_v56 }
 0x209   : > { %v1136_v11 = vpack.c.bf16 %v1092_v7, %v1090_v20  ;;  %v1019_v58 = vmul.f32 %v4072_v30, %v944_v21  ;;  %v1020_v28 = vmul.f32 %v4084_v53, %v945_v15 }
 0x20a   : > { %v1096_v5 = vadd.f32 %v4097_v13, %v1021_v3  ;;  %v1135_v22 = vpack.c.bf16 %v1091_v27, %v1089_v25  ;;  %v1018_v14 = vmul.f32 %v4084_v53, %v943_v47 }
 0x20b   : > { %v1094_v9 = vadd.f32 %v4097_v13, %v1019_v58  ;;  %v1095_v57 = vadd.f32 %v4094_v62, %v1020_v28 }
 0x20c   : > { %v1093_v18 = vadd.f32 %v4094_v62, %v1018_v14 }
 0x20d   : > { %1456 = vmatmul.mubr.bf16.gmra.mrb[28].mxu0 %v1131_v17  ;;  %1853 = vmatmul.mubr.bf16.gmra.mrb[28].mxu1 %v1131_v17  ;;  %v1138_v39 = vpack.c.bf16 %v1096_v5, %v1094_v9 }
 0x20e   : > { %1465 = vmatprep.mubr.bf16.mxu0 %v1134_v44  ;;  %1862 = vmatprep.mubr.bf16.mxu1 %v1134_v44  ;;  %v1137_v19 = vpack.c.bf16 %v1095_v57, %v1093_v18 }
 0x215   : > { %1466 = vmatmul.mubr.bf16.gmra.mrb[32].mxu0 %v1133_v35  ;;  %1863 = vmatmul.mubr.bf16.gmra.mrb[32].mxu1 %v1133_v35 }
 0x216   : > { %1475 = vmatprep.mubr.bf16.mxu0 %v1136_v11  ;;  %1872 = vmatprep.mubr.bf16.mxu1 %v1136_v11 }
 0x21d   : > { %1476 = vmatmul.mubr.bf16.gmra.mrb[36].mxu0 %v1135_v22  ;;  %1873 = vmatmul.mubr.bf16.gmra.mrb[36].mxu1 %v1135_v22 }
 0x21e   : > { %1485 = vmatprep.mubr.bf16.mxu0 %v1138_v39  ;;  %1882 = vmatprep.mubr.bf16.mxu1 %v1138_v39 }
 0x225   : > { %1486 = vmatmul.mubr.bf16.gmra.mrb[40].mxu0 %v1137_v19  ;;  %1883 = vmatmul.mubr.bf16.gmra.mrb[40].mxu1 %v1137_v19 }
 0x250   : > { %v779_v56 = vpop.xlane.xlu0 %778 }
 0x251   : > { %v829_v34 = vmul.f32 0.00390625, %v779_v56 }
 0x253   : > { %v861_v6 = vadd.f32 1e-05, %v829_v34 }
 0x254   : > { %v782_v36 = vpop.xlane.xlu1 %781 }
 0x255   : > { %3050 = vrsqrt.f32 %v861_v6  ;;  %v830_v29 = vmul.f32 0.00390625, %v782_v36 }
 0x257   : > { %v862_v2 = vadd.f32 1e-05, %v830_v29 }
 0x258   : > { %v785_v42 = vpop.xlane.xlu0 %784 }
 0x259   : > { %3052 = vrsqrt.f32 %v862_v2  ;;  %v831_v24 = vmul.f32 0.00390625, %v785_v42  ;;  %v4810_v2 = vld [vmem:[#allocation24_spill] sm:$0xff] }
 0x25b   : > { %v863_v16 = vadd.f32 1e-05, %v831_v24 }
 0x25c   : > { %v788_v17 = vpop.xlane.xlu1 %787 }
 0x25d   : > { %3054 = vrsqrt.f32 %v863_v16  ;;  %v832_v59 = vmul.f32 0.00390625, %v788_v17 }
 0x25f   : > { %v3051_v44 = vpop.eup %3050  ;;  %v864_v61 = vadd.f32 1e-05, %v832_v59 }
 0x260   : > { %v791_v49 = vpop.xlane.xlu0 %790  ;;  %v948_v26 = vmul.f32 %v3051_v44, %v4048_v8  ;;  %v947_v40 = vmul.f32 %v3051_v44, %v4045_v31 }
 0x261   : > { %3056 = vrsqrt.f32 %v864_v61  ;;  %v833_v45 = vmul.f32 0.00390625, %v791_v49 }
 0x262   : > { %v1023_v7 = vmul.f32 %v4072_v30, %v948_v26  ;;  %v1022_v32 = vmul.f32 %v4084_v53, %v947_v40 }
 0x263   : > { %v3053_v33 = vpop.eup %3052  ;;  %v865_v23 = vadd.f32 1e-05, %v833_v45  ;;  %v794_v38 = vpop.xlane.xlu1 %793 }
 0x264   : > { %v950_v60 = vmul.f32 %v3053_v33, %v4060_v0  ;;  %v949_v20 = vmul.f32 %v3053_v33, %v4057_v48  ;;  %v834_v21 = vmul.f32 0.00390625, %v794_v38  ;;  %v1098_v11 = vadd.f32 %v4097_v13, %v1023_v7 }
 0x265   : > { %3058 = vrsqrt.f32 %v865_v23  ;;  %v1097_v3 = vadd.f32 %v4094_v62, %v1022_v32 }
 0x266   : > { %v1025_v35 = vmul.f32 %v4072_v30, %v950_v60  ;;  %v1024_v8 = vmul.f32 %v4084_v53, %v949_v20  ;;  %v866_v4 = vadd.f32 1e-05, %v834_v21  ;;  %v4811_v21 = vld [vmem:[#allocation23_spill] sm:$0xff] }
 0x267   : > { %v3055_v31 = vpop.eup %3054 }
 0x268   : > { %v1100_v55 = vadd.f32 %v4097_v13, %v1025_v35  ;;  %v1099_v58 = vadd.f32 %v4094_v62, %v1024_v8  ;;  %v952_v0 = vmul.f32 %v3055_v31, %v4078_v37  ;;  %v951_v48 = vmul.f32 %v3055_v31, %v4075_v50 }
 0x269   : > { %3060 = vrsqrt.f32 %v866_v4  ;;  %v797_v27 = vpop.xlane.xlu0 %796 }
 0x26a   : > { %v835_v15 = vmul.f32 0.00390625, %v797_v27  ;;  %v1140_v5 = vpack.c.bf16 %v1100_v55, %v1098_v11  ;;  %v1139_v25 = vpack.c.bf16 %v1099_v58, %v1097_v3  ;;  %v1027_v9 = vmul.f32 %v4072_v30, %v952_v0 }
 0x26b   : > { %v3057_v47 = vpop.eup %3056  ;;  %v1026_v22 = vmul.f32 %v4084_v53, %v951_v48 }
 0x26c   : > { %v867_v28 = vadd.f32 1e-05, %v835_v15  ;;  %v800_v39 = vpop.xlane.xlu1 %799  ;;  %1495 = vmatprep.mubr.bf16.mxu0 %v1140_v5  ;;  %1892 = vmatprep.mubr.bf16.mxu1 %v1140_v5  ;;  %v954_v14 = vmul.f32 %v3057_v47, %v4103_v46  ;;  %v953_v37 = vmul.f32 %v3057_v47, %v4100_v10  ;;  %v1102_v34 = vadd.f32 %v4097_v13, %v1027_v9 }
 0x26d   : > { %v836_v57 = vmul.f32 0.00390625, %v800_v39  ;;  %1496 = vmatmul.mubr.bf16.gmra.mrb[44].mxu0 %v1139_v25  ;;  %1893 = vmatmul.mubr.bf16.gmra.mrb[44].mxu1 %v1139_v25  ;;  %v1101_v6 = vadd.f32 %v4094_v62, %v1026_v22  ;;  %v4812_v39 = vld [vmem:[#allocation22_spill] sm:$0xff] }
 0x26e   : > { %3062 = vrsqrt.f32 %v867_v28  ;;  %v1029_v50 = vmul.f32 %v4072_v30, %v954_v14  ;;  %v1028_v18 = vmul.f32 %v4084_v53, %v953_v37  ;;  %v4813_v37 = vld [vmem:[#allocation33_spill] sm:$0xff] }
 0x26f   : > { %v3059_v19 = vpop.eup %3058  ;;  %v868_v56 = vadd.f32 1e-05, %v836_v57 }
 0x270   : > { %v803_v36 = vpop.xlane.xlu0 %802  ;;  %v1104_v29 = vadd.f32 %v4097_v13, %v1029_v50  ;;  %v1103_v46 = vadd.f32 %v4094_v62, %v1028_v18  ;;  %v956_v10 = vmul.f32 %v3059_v19, %v4119_v63  ;;  %v955_v42 = vmul.f32 %v3059_v19, %v4810_v2 }
 0x271   : > { %3064 = vrsqrt.f32 %v868_v56  ;;  %v837_v24 = vmul.f32 0.00390625, %v803_v36 }
 0x272   : > { %v1142_v16 = vpack.c.bf16 %v1104_v29, %v1102_v34  ;;  %v1141_v17 = vpack.c.bf16 %v1103_v46, %v1101_v6  ;;  %v1031_v61 = vmul.f32 %v4072_v30, %v956_v10  ;;  %v1030_v45 = vmul.f32 %v4084_v53, %v955_v42 }
 0x273   : > { %v3061_v59 = vpop.eup %3060  ;;  %v869_v44 = vadd.f32 1e-05, %v837_v24 }
 0x274   : > { %v806_v49 = vpop.xlane.xlu1 %805  ;;  %1505 = vmatprep.mubr.bf16.mxu0 %v1142_v16  ;;  %1902 = vmatprep.mubr.bf16.mxu1 %v1142_v16  ;;  %v958_v26 = vmul.f32 %v3061_v59, %v4134_v1  ;;  %v957_v40 = vmul.f32 %v3061_v59, %v4131_v12  ;;  %v1106_v38 = vadd.f32 %v4097_v13, %v1031_v61 }
 0x275   : > { %3066 = vrsqrt.f32 %v869_v44  ;;  %v838_v63 = vmul.f32 0.00390625, %v806_v49  ;;  %1506 = vmatmul.mubr.bf16.gmra.mrb[48].mxu0 %v1141_v17  ;;  %1903 = vmatmul.mubr.bf16.gmra.mrb[48].mxu1 %v1141_v17  ;;  %v1105_v1 = vadd.f32 %v4094_v62, %v1030_v45 }
 0x276   : > { %v1033_v33 = vmul.f32 %v4072_v30, %v958_v26  ;;  %v1032_v23 = vmul.f32 %v4084_v53, %v957_v40 }
 0x277   : > { %v870_v7 = vadd.f32 1e-05, %v838_v63 }
 0x278   : > { %v3063_v32 = vpop.eup %3062  ;;  %v1108_v60 = vadd.f32 %v4097_v13, %v1033_v33  ;;  %v1107_v12 = vadd.f32 %v4094_v62, %v1032_v23 }
 0x279   : > { %3068 = vrsqrt.f32 %v870_v7  ;;  %v960_v20 = vmul.f32 %v3063_v32, %v4150_v51  ;;  %v959_v35 = vmul.f32 %v3063_v32, %v4811_v21 }
 0x27a   : > { %v1144_v8 = vpack.c.bf16 %v1108_v60, %v1106_v38  ;;  %v1143_v31 = vpack.c.bf16 %v1107_v12, %v1105_v1 }
 0x27b   : > { %v3065_v4 = vpop.eup %3064  ;;  %v1035_v11 = vmul.f32 %v4072_v30, %v960_v20  ;;  %v1034_v3 = vmul.f32 %v4084_v53, %v959_v35 }
 0x27c   : > { %1515 = vmatprep.mubr.bf16.mxu0 %v1144_v8  ;;  %1912 = vmatprep.mubr.bf16.mxu1 %v1144_v8  ;;  %v962_v55 = vmul.f32 %v3065_v4, %v4165_v52  ;;  %v961_v58 = vmul.f32 %v3065_v4, %v4162_v41 }
 0x27d   : > { %1516 = vmatmul.mubr.bf16.gmra.mrb[52].mxu0 %v1143_v31  ;;  %1913 = vmatmul.mubr.bf16.gmra.mrb[52].mxu1 %v1143_v31  ;;  %v1110_v27 = vadd.f32 %v4097_v13, %v1035_v11  ;;  %v1109_v15 = vadd.f32 %v4094_v62, %v1034_v3 }
 0x27e   : > { %v1037_v0 = vmul.f32 %v4072_v30, %v962_v55  ;;  %v1036_v51 = vmul.f32 %v4084_v53, %v961_v58 }
 0x27f   : > { %v3067_v48 = vpop.eup %3066 }
 0x280   : > { %v1112_v5 = vadd.f32 %v4097_v13, %v1037_v0  ;;  %v1111_v25 = vadd.f32 %v4094_v62, %v1036_v51  ;;  %v964_v47 = vmul.f32 %v3067_v48, %v4179_v54  ;;  %v963_v52 = vmul.f32 %v3067_v48, %v4176_v43 }
 0x282   : > { %v1146_v41 = vpack.c.bf16 %v1112_v5, %v1110_v27  ;;  %v1145_v9 = vpack.c.bf16 %v1111_v25, %v1109_v15  ;;  %v1039_v28 = vmul.f32 %v4072_v30, %v964_v47  ;;  %v1038_v50 = vmul.f32 %v4084_v53, %v963_v52 }
 0x283   : > { %v3069_v22 = vpop.eup %3068 }
 0x284   : > { %1525 = vmatprep.mubr.bf16.mxu0 %v1146_v41  ;;  %1922 = vmatprep.mubr.bf16.mxu1 %v1146_v41  ;;  %v966_v14 = vmul.f32 %v3069_v22, %v4812_v39  ;;  %v965_v57 = vmul.f32 %v3069_v22, %v4813_v37  ;;  %v1114_v43 = vadd.f32 %v4097_v13, %v1039_v28 }
 0x285   : > { %1526 = vmatmul.mubr.bf16.gmra.mrb[56].mxu0 %v1145_v9  ;;  %1923 = vmatmul.mubr.bf16.gmra.mrb[56].mxu1 %v1145_v9  ;;  %v1113_v56 = vadd.f32 %v4094_v62, %v1038_v50 }
 0x286   : > { %v1041_v18 = vmul.f32 %v4072_v30, %v966_v14  ;;  %v1040_v54 = vmul.f32 %v4084_v53, %v965_v57  ;;  %v1181_v30 = vld [vmem:[%s4680_s4] sm:$0x3] }
 0x287   : > { %v1578_v53 = vld [vmem:[%s4682_s6] sm:$0x3] }
 0x288   : > { %v1116_v19 = vadd.f32 %v4097_v13, %v1041_v18  ;;  %v1115_v34 = vadd.f32 %v4094_v62, %v1040_v54  ;;  %v4814_v13 = vld [vmem:[#allocation47_spill] sm:$0xff]  ;;  %v4815_v62 = vld [vmem:[#allocation46_spill] sm:$0xff] }
 0x289   : > { %v4365_v29 = vrot.slane %v1181_v30, %v4814_v13  ;;  %v4368_v46 = vrot.slane %v1578_v53, %v4814_v13  ;;  %v4371_v10 = vrot.slane %v1181_v30, %v4815_v62  ;;  %v4374_v2 = vrot.slane %v1578_v53, %v4815_v62 }
 0x28a   : > { %v1148_v6 = vpack.c.bf16 %v1116_v19, %v1114_v43  ;;  %v1147_v36 = vpack.c.bf16 %v1115_v34, %v1113_v56 }
 0x28c   : > { %1535 = vmatprep.mubr.bf16.mxu0 %v1148_v6  ;;  %1932 = vmatprep.mubr.bf16.mxu1 %v1148_v6 }
 0x28d   : > { %1536 = vmatmul.mubr.bf16.gmra.mrb[60].mxu0 %v1147_v36  ;;  %1933 = vmatmul.mubr.bf16.gmra.mrb[60].mxu1 %v1147_v36 }
 0x2a5   : > { %v1387_v42 = vpop.f32.mrb[0].mxu0  ;;  %v1784_v24 = vpop.f32.mrb[0].mxu1 }
 0x2a6   : > { %v1388_v16 = vadd.f32 %v1387_v42, %v4365_v29  ;;  %v1785_v17 = vadd.f32 %v1784_v24, %v4368_v46  ;;  %v1389_v59 = vpop.f32.mrb[1].mxu0  ;;  %v1786_v44 = vpop.f32.mrb[1].mxu1 }
 0x2a7   : > { %v1390_v61 = vadd.f32 %v1389_v59, %v4371_v10  ;;  %v1787_v49 = vadd.f32 %v1786_v44, %v4374_v2  ;;  %v1391_v26 = vpop.f32.mrb[2].mxu0  ;;  %v1788_v40 = vpop.f32.mrb[2].mxu1 }
 0x2a8   : > { %v1392_v45 = vadd.f32 %v1391_v26, %v4365_v29  ;;  %v1789_v63 = vadd.f32 %v1788_v40, %v4368_v46  ;;  %v1393_v33 = vpop.f32.mrb[3].mxu0  ;;  %v1790_v23 = vpop.f32.mrb[3].mxu1 }
 0x2a9   : > { %v2734_v7 = vpack.c.bf16 %v1390_v61, %v1388_v16  ;;  %v2766_v32 = vpack.c.bf16 %v1787_v49, %v1785_v17  ;;  %v1394_v38 = vadd.f32 %v1393_v33, %v4371_v10  ;;  %v1791_v60 = vadd.f32 %v1790_v23, %v4374_v2 }
 0x2ab   : > { %2135 = vst [vmem:[%s4385_s25] sm:$0xff] %v2734_v7  ;;  %2359 = vst [vmem:[%s4388_s20] sm:$0xff] %v2766_v32  ;;  %v2735_v1 = vpack.c.bf16 %v1394_v38, %v1392_v45  ;;  %v2767_v12 = vpack.c.bf16 %v1791_v60, %v1789_v63 }
 0x2ad   : > { %2136 = vst [vmem:[%s4385_s25 + $0x8] sm:$0xff] %v2735_v1  ;;  %2360 = vst [vmem:[%s4388_s20 + $0x8] sm:$0xff] %v2767_v12 }
 0x2ae   : > { %v1397_v20 = vpop.f32.mrb[4].mxu0  ;;  %v1794_v21 = vpop.f32.mrb[4].mxu1 }
 0x2af   : > { %v1398_v35 = vadd.f32 %v1397_v20, %v4365_v29  ;;  %v1795_v8 = vadd.f32 %v1794_v21, %v4368_v46  ;;  %v1399_v31 = vpop.f32.mrb[5].mxu0  ;;  %v1796_v4 = vpop.f32.mrb[5].mxu1 }
 0x2b0   : > { %v1400_v11 = vadd.f32 %v1399_v31, %v4371_v10  ;;  %v1797_v3 = vadd.f32 %v1796_v4, %v4374_v2  ;;  %v1401_v55 = vpop.f32.mrb[6].mxu0  ;;  %v1798_v58 = vpop.f32.mrb[6].mxu1 }
 0x2b1   : > { %v1402_v0 = vadd.f32 %v1401_v55, %v4365_v29  ;;  %v1799_v51 = vadd.f32 %v1798_v58, %v4368_v46  ;;  %v1403_v48 = vpop.f32.mrb[7].mxu0  ;;  %v1800_v27 = vpop.f32.mrb[7].mxu1 }
 0x2b2   : > { %v2736_v15 = vpack.c.bf16 %v1400_v11, %v1398_v35  ;;  %v2768_v5 = vpack.c.bf16 %v1797_v3, %v1795_v8  ;;  %v1404_v25 = vadd.f32 %v1403_v48, %v4371_v10  ;;  %v1801_v47 = vadd.f32 %v1800_v27, %v4374_v2 }
 0x2b4   : > { %2137 = vst [vmem:[%s4385_s25 + $0x10] sm:$0xff] %v2736_v15  ;;  %2361 = vst [vmem:[%s4388_s20 + $0x10] sm:$0xff] %v2768_v5  ;;  %v2737_v52 = vpack.c.bf16 %v1404_v25, %v1402_v0  ;;  %v2769_v41 = vpack.c.bf16 %v1801_v47, %v1799_v51 }
 0x2b6   : > { %2138 = vst [vmem:[%s4385_s25 + $0x18] sm:$0xff] %v2737_v52  ;;  %2362 = vst [vmem:[%s4388_s20 + $0x18] sm:$0xff] %v2769_v41  ;;  %v1407_v9 = vpop.f32.mrb[8].mxu0 }
 0x2b7   : > { %v1804_v22 = vpop.f32.mrb[8].mxu1  ;;  %v1408_v28 = vadd.f32 %v1407_v9, %v4365_v29  ;;  %v1409_v14 = vpop.f32.mrb[9].mxu0 }
 0x2b8   : > { %v1805_v39 = vadd.f32 %v1804_v22, %v4368_v46  ;;  %v1806_v37 = vpop.f32.mrb[9].mxu1  ;;  %v1410_v57 = vadd.f32 %v1409_v14, %v4371_v10  ;;  %v1411_v18 = vpop.f32.mrb[10].mxu0 }
 0x2b9   : > { %v1807_v50 = vadd.f32 %v1806_v37, %v4374_v2  ;;  %v1808_v54 = vpop.f32.mrb[10].mxu1  ;;  %v1412_v43 = vadd.f32 %v1411_v18, %v4365_v29  ;;  %v1413_v56 = vpop.f32.mrb[11].mxu0 }
 0x2ba   : > { %v1809_v19 = vadd.f32 %v1808_v54, %v4368_v46  ;;  %v1810_v34 = vpop.f32.mrb[11].mxu1  ;;  %v2738_v6 = vpack.c.bf16 %v1410_v57, %v1408_v28  ;;  %v1414_v30 = vadd.f32 %v1413_v56, %v4371_v10 }
 0x2bb   : > { %v2770_v36 = vpack.c.bf16 %v1807_v50, %v1805_v39  ;;  %v1811_v53 = vadd.f32 %v1810_v34, %v4374_v2 }
 0x2bc   : > { %2139 = vst [vmem:[%s4385_s25 + $0x20] sm:$0xff] %v2738_v6  ;;  %v2739_v13 = vpack.c.bf16 %v1414_v30, %v1412_v43 }
 0x2bd   : > { %2363 = vst [vmem:[%s4388_s20 + $0x20] sm:$0xff] %v2770_v36  ;;  %v2771_v62 = vpack.c.bf16 %v1811_v53, %v1809_v19 }
 0x2be   : > { %2140 = vst [vmem:[%s4385_s25 + $0x28] sm:$0xff] %v2739_v13 }
 0x2bf   : > { %2364 = vst [vmem:[%s4388_s20 + $0x28] sm:$0xff] %v2771_v62 }
 0x2c0   : > { %v1417_v42 = vpop.f32.mrb[12].mxu0  ;;  %v1814_v24 = vpop.f32.mrb[12].mxu1 }
 0x2c1   : > { %v1418_v16 = vadd.f32 %v1417_v42, %v4365_v29  ;;  %v1815_v17 = vadd.f32 %v1814_v24, %v4368_v46  ;;  %v1419_v59 = vpop.f32.mrb[13].mxu0  ;;  %v1816_v44 = vpop.f32.mrb[13].mxu1 }
 0x2c2   : > { %v1420_v61 = vadd.f32 %v1419_v59, %v4371_v10  ;;  %v1817_v49 = vadd.f32 %v1816_v44, %v4374_v2  ;;  %v1421_v26 = vpop.f32.mrb[14].mxu0  ;;  %v1818_v40 = vpop.f32.mrb[14].mxu1 }
 0x2c3   : > { %v1422_v45 = vadd.f32 %v1421_v26, %v4365_v29  ;;  %v1819_v63 = vadd.f32 %v1818_v40, %v4368_v46  ;;  %v1423_v33 = vpop.f32.mrb[15].mxu0  ;;  %v1820_v23 = vpop.f32.mrb[15].mxu1 }
 0x2c4   : > { %v2740_v7 = vpack.c.bf16 %v1420_v61, %v1418_v16  ;;  %v2772_v32 = vpack.c.bf16 %v1817_v49, %v1815_v17  ;;  %v1424_v38 = vadd.f32 %v1423_v33, %v4371_v10  ;;  %v1821_v60 = vadd.f32 %v1820_v23, %v4374_v2 }
 0x2c6   : > { %2141 = vst [vmem:[%s4385_s25 + $0x30] sm:$0xff] %v2740_v7  ;;  %2365 = vst [vmem:[%s4388_s20 + $0x30] sm:$0xff] %v2772_v32  ;;  %v2741_v1 = vpack.c.bf16 %v1424_v38, %v1422_v45  ;;  %v2773_v12 = vpack.c.bf16 %v1821_v60, %v1819_v63 }
 0x2c8   : > { %2142 = vst [vmem:[%s4385_s25 + $0x38] sm:$0xff] %v2741_v1  ;;  %2366 = vst [vmem:[%s4388_s20 + $0x38] sm:$0xff] %v2773_v12  ;;  %v1427_v20 = vpop.f32.mrb[16].mxu0  ;;  %v1824_v21 = vpop.f32.mrb[16].mxu1 }
 0x2c9   : > { %v1428_v35 = vadd.f32 %v1427_v20, %v4365_v29  ;;  %v1825_v8 = vadd.f32 %v1824_v21, %v4368_v46  ;;  %v1429_v31 = vpop.f32.mrb[17].mxu0  ;;  %v1826_v4 = vpop.f32.mrb[17].mxu1 }
 0x2ca   : > { %v1430_v11 = vadd.f32 %v1429_v31, %v4371_v10  ;;  %v1827_v3 = vadd.f32 %v1826_v4, %v4374_v2  ;;  %v1431_v55 = vpop.f32.mrb[18].mxu0  ;;  %v1828_v58 = vpop.f32.mrb[18].mxu1 }
 0x2cb   : > { %v1432_v0 = vadd.f32 %v1431_v55, %v4365_v29  ;;  %v1829_v51 = vadd.f32 %v1828_v58, %v4368_v46  ;;  %v1433_v48 = vpop.f32.mrb[19].mxu0  ;;  %v1830_v27 = vpop.f32.mrb[19].mxu1 }
 0x2cc   : > { %v2742_v15 = vpack.c.bf16 %v1430_v11, %v1428_v35  ;;  %v2774_v5 = vpack.c.bf16 %v1827_v3, %v1825_v8  ;;  %v1434_v25 = vadd.f32 %v1433_v48, %v4371_v10  ;;  %v1831_v47 = vadd.f32 %v1830_v27, %v4374_v2 }
 0x2ce   : > { %2143 = vst [vmem:[%s4385_s25 + $0x40] sm:$0xff] %v2742_v15  ;;  %2367 = vst [vmem:[%s4388_s20 + $0x40] sm:$0xff] %v2774_v5  ;;  %v2743_v52 = vpack.c.bf16 %v1434_v25, %v1432_v0  ;;  %v2775_v41 = vpack.c.bf16 %v1831_v47, %v1829_v51 }
 0x2d0   : > { %2144 = vst [vmem:[%s4385_s25 + $0x48] sm:$0xff] %v2743_v52  ;;  %2368 = vst [vmem:[%s4388_s20 + $0x48] sm:$0xff] %v2775_v41  ;;  %v1437_v9 = vpop.f32.mrb[20].mxu0  ;;  %v1834_v22 = vpop.f32.mrb[20].mxu1 }
 0x2d1   : > { %v1438_v28 = vadd.f32 %v1437_v9, %v4365_v29  ;;  %v1835_v39 = vadd.f32 %v1834_v22, %v4368_v46  ;;  %v1439_v14 = vpop.f32.mrb[21].mxu0  ;;  %v1836_v37 = vpop.f32.mrb[21].mxu1 }
 0x2d2   : > { %v1440_v57 = vadd.f32 %v1439_v14, %v4371_v10  ;;  %v1837_v50 = vadd.f32 %v1836_v37, %v4374_v2  ;;  %v1441_v18 = vpop.f32.mrb[22].mxu0  ;;  %v1838_v54 = vpop.f32.mrb[22].mxu1 }
 0x2d3   : > { %v1442_v43 = vadd.f32 %v1441_v18, %v4365_v29  ;;  %v1839_v19 = vadd.f32 %v1838_v54, %v4368_v46  ;;  %v1443_v56 = vpop.f32.mrb[23].mxu0  ;;  %v1840_v34 = vpop.f32.mrb[23].mxu1 }
 0x2d4   : > { %v2744_v6 = vpack.c.bf16 %v1440_v57, %v1438_v28  ;;  %v2776_v36 = vpack.c.bf16 %v1837_v50, %v1835_v39  ;;  %v1444_v30 = vadd.f32 %v1443_v56, %v4371_v10  ;;  %v1841_v53 = vadd.f32 %v1840_v34, %v4374_v2 }
 0x2d6   : > { %2145 = vst [vmem:[%s4385_s25 + $0x50] sm:$0xff] %v2744_v6  ;;  %2369 = vst [vmem:[%s4388_s20 + $0x50] sm:$0xff] %v2776_v36  ;;  %v2745_v13 = vpack.c.bf16 %v1444_v30, %v1442_v43  ;;  %v2777_v62 = vpack.c.bf16 %v1841_v53, %v1839_v19 }
 0x2d8   : > { %2146 = vst [vmem:[%s4385_s25 + $0x58] sm:$0xff] %v2745_v13  ;;  %2370 = vst [vmem:[%s4388_s20 + $0x58] sm:$0xff] %v2777_v62  ;;  %v1447_v42 = vpop.f32.mrb[24].mxu0  ;;  %v1844_v24 = vpop.f32.mrb[24].mxu1 }
 0x2d9   : > { %v1448_v16 = vadd.f32 %v1447_v42, %v4365_v29  ;;  %v1845_v17 = vadd.f32 %v1844_v24, %v4368_v46  ;;  %v1449_v59 = vpop.f32.mrb[25].mxu0  ;;  %v1846_v44 = vpop.f32.mrb[25].mxu1 }
 0x2da   : > { %v1450_v61 = vadd.f32 %v1449_v59, %v4371_v10  ;;  %v1847_v49 = vadd.f32 %v1846_v44, %v4374_v2  ;;  %v1451_v26 = vpop.f32.mrb[26].mxu0  ;;  %v1848_v40 = vpop.f32.mrb[26].mxu1 }
 0x2db   : > { %v1452_v45 = vadd.f32 %v1451_v26, %v4365_v29  ;;  %v1849_v63 = vadd.f32 %v1848_v40, %v4368_v46  ;;  %v1453_v33 = vpop.f32.mrb[27].mxu0  ;;  %v1850_v23 = vpop.f32.mrb[27].mxu1 }
 0x2dc   : > { %v2746_v7 = vpack.c.bf16 %v1450_v61, %v1448_v16  ;;  %v2778_v32 = vpack.c.bf16 %v1847_v49, %v1845_v17  ;;  %v1454_v38 = vadd.f32 %v1453_v33, %v4371_v10  ;;  %v1851_v60 = vadd.f32 %v1850_v23, %v4374_v2 }
 0x2de   : > { %2147 = vst [vmem:[%s4385_s25 + $0x60] sm:$0xff] %v2746_v7  ;;  %2371 = vst [vmem:[%s4388_s20 + $0x60] sm:$0xff] %v2778_v32  ;;  %v2747_v1 = vpack.c.bf16 %v1454_v38, %v1452_v45  ;;  %v2779_v12 = vpack.c.bf16 %v1851_v60, %v1849_v63 }
 0x2e0   : > { %2148 = vst [vmem:[%s4385_s25 + $0x68] sm:$0xff] %v2747_v1  ;;  %2372 = vst [vmem:[%s4388_s20 + $0x68] sm:$0xff] %v2779_v12  ;;  %v1457_v20 = vpop.f32.mrb[28].mxu0  ;;  %v1854_v21 = vpop.f32.mrb[28].mxu1 }
 0x2e1   : > { %v1458_v35 = vadd.f32 %v1457_v20, %v4365_v29  ;;  %v1855_v8 = vadd.f32 %v1854_v21, %v4368_v46  ;;  %v1459_v31 = vpop.f32.mrb[29].mxu0  ;;  %v1856_v4 = vpop.f32.mrb[29].mxu1 }
 0x2e2   : > { %v1460_v11 = vadd.f32 %v1459_v31, %v4371_v10  ;;  %v1857_v3 = vadd.f32 %v1856_v4, %v4374_v2  ;;  %v1461_v55 = vpop.f32.mrb[30].mxu0  ;;  %v1858_v58 = vpop.f32.mrb[30].mxu1 }
 0x2e3   : > { %v1462_v0 = vadd.f32 %v1461_v55, %v4365_v29  ;;  %v1859_v51 = vadd.f32 %v1858_v58, %v4368_v46  ;;  %v1463_v48 = vpop.f32.mrb[31].mxu0  ;;  %v1860_v27 = vpop.f32.mrb[31].mxu1 }
 0x2e4   : > { %v2748_v15 = vpack.c.bf16 %v1460_v11, %v1458_v35  ;;  %v2780_v5 = vpack.c.bf16 %v1857_v3, %v1855_v8  ;;  %v1464_v25 = vadd.f32 %v1463_v48, %v4371_v10  ;;  %v1861_v47 = vadd.f32 %v1860_v27, %v4374_v2 }
 0x2e6   : > { %2149 = vst [vmem:[%s4385_s25 + $0x70] sm:$0xff] %v2748_v15  ;;  %2373 = vst [vmem:[%s4388_s20 + $0x70] sm:$0xff] %v2780_v5  ;;  %v2749_v52 = vpack.c.bf16 %v1464_v25, %v1462_v0  ;;  %v2781_v41 = vpack.c.bf16 %v1861_v47, %v1859_v51 }
 0x2e8   : > { %2150 = vst [vmem:[%s4385_s25 + $0x78] sm:$0xff] %v2749_v52  ;;  %2374 = vst [vmem:[%s4388_s20 + $0x78] sm:$0xff] %v2781_v41  ;;  %v1467_v9 = vpop.f32.mrb[32].mxu0  ;;  %v1864_v22 = vpop.f32.mrb[32].mxu1 }
 0x2e9   : > { %v1468_v28 = vadd.f32 %v1467_v9, %v4365_v29  ;;  %v1865_v39 = vadd.f32 %v1864_v22, %v4368_v46  ;;  %v1469_v14 = vpop.f32.mrb[33].mxu0  ;;  %v1866_v37 = vpop.f32.mrb[33].mxu1 }
 0x2ea   : > { %v1470_v57 = vadd.f32 %v1469_v14, %v4371_v10  ;;  %v1867_v50 = vadd.f32 %v1866_v37, %v4374_v2  ;;  %v1471_v18 = vpop.f32.mrb[34].mxu0  ;;  %v1868_v54 = vpop.f32.mrb[34].mxu1 }
 0x2eb   : > { %v1472_v43 = vadd.f32 %v1471_v18, %v4365_v29  ;;  %v1869_v19 = vadd.f32 %v1868_v54, %v4368_v46  ;;  %v1473_v56 = vpop.f32.mrb[35].mxu0  ;;  %v1870_v34 = vpop.f32.mrb[35].mxu1 }
 0x2ec   : > { %v2750_v6 = vpack.c.bf16 %v1470_v57, %v1468_v28  ;;  %v2782_v36 = vpack.c.bf16 %v1867_v50, %v1865_v39  ;;  %v1474_v30 = vadd.f32 %v1473_v56, %v4371_v10  ;;  %v1871_v53 = vadd.f32 %v1870_v34, %v4374_v2 }
 0x2ee   : > { %2151 = vst [vmem:[%s4385_s25 + $0x80] sm:$0xff] %v2750_v6  ;;  %2375 = vst [vmem:[%s4388_s20 + $0x80] sm:$0xff] %v2782_v36  ;;  %v2751_v13 = vpack.c.bf16 %v1474_v30, %v1472_v43  ;;  %v2783_v62 = vpack.c.bf16 %v1871_v53, %v1869_v19 }
 0x2f0   : > { %2152 = vst [vmem:[%s4385_s25 + $0x88] sm:$0xff] %v2751_v13  ;;  %2376 = vst [vmem:[%s4388_s20 + $0x88] sm:$0xff] %v2783_v62  ;;  %v1477_v42 = vpop.f32.mrb[36].mxu0  ;;  %v1874_v24 = vpop.f32.mrb[36].mxu1 }
 0x2f1   : > { %v1478_v16 = vadd.f32 %v1477_v42, %v4365_v29  ;;  %v1875_v17 = vadd.f32 %v1874_v24, %v4368_v46  ;;  %v1479_v59 = vpop.f32.mrb[37].mxu0  ;;  %v1876_v44 = vpop.f32.mrb[37].mxu1 }
 0x2f2   : > { %v1480_v61 = vadd.f32 %v1479_v59, %v4371_v10  ;;  %v1877_v49 = vadd.f32 %v1876_v44, %v4374_v2  ;;  %v1481_v26 = vpop.f32.mrb[38].mxu0  ;;  %v1878_v40 = vpop.f32.mrb[38].mxu1 }
 0x2f3   : > { %v1482_v45 = vadd.f32 %v1481_v26, %v4365_v29  ;;  %v1879_v63 = vadd.f32 %v1878_v40, %v4368_v46  ;;  %v1483_v33 = vpop.f32.mrb[39].mxu0  ;;  %v1880_v23 = vpop.f32.mrb[39].mxu1 }
 0x2f4   : > { %v2752_v7 = vpack.c.bf16 %v1480_v61, %v1478_v16  ;;  %v2784_v32 = vpack.c.bf16 %v1877_v49, %v1875_v17  ;;  %v1484_v38 = vadd.f32 %v1483_v33, %v4371_v10  ;;  %v1881_v60 = vadd.f32 %v1880_v23, %v4374_v2 }
 0x2f6   : > { %2153 = vst [vmem:[%s4385_s25 + $0x90] sm:$0xff] %v2752_v7  ;;  %2377 = vst [vmem:[%s4388_s20 + $0x90] sm:$0xff] %v2784_v32  ;;  %v2753_v1 = vpack.c.bf16 %v1484_v38, %v1482_v45  ;;  %v2785_v12 = vpack.c.bf16 %v1881_v60, %v1879_v63 }
 0x2f8   : > { %2154 = vst [vmem:[%s4385_s25 + $0x98] sm:$0xff] %v2753_v1  ;;  %2378 = vst [vmem:[%s4388_s20 + $0x98] sm:$0xff] %v2785_v12  ;;  %v1487_v20 = vpop.f32.mrb[40].mxu0  ;;  %v1884_v21 = vpop.f32.mrb[40].mxu1 }
 0x2f9   : > { %v1488_v35 = vadd.f32 %v1487_v20, %v4365_v29  ;;  %v1885_v8 = vadd.f32 %v1884_v21, %v4368_v46  ;;  %v1489_v31 = vpop.f32.mrb[41].mxu0  ;;  %v1886_v4 = vpop.f32.mrb[41].mxu1 }
 0x2fa   : > { %v1490_v11 = vadd.f32 %v1489_v31, %v4371_v10  ;;  %v1887_v3 = vadd.f32 %v1886_v4, %v4374_v2  ;;  %v1491_v55 = vpop.f32.mrb[42].mxu0  ;;  %v1888_v58 = vpop.f32.mrb[42].mxu1 }
 0x2fb   : > { %v1492_v0 = vadd.f32 %v1491_v55, %v4365_v29  ;;  %v1889_v51 = vadd.f32 %v1888_v58, %v4368_v46  ;;  %v1493_v48 = vpop.f32.mrb[43].mxu0  ;;  %v1890_v27 = vpop.f32.mrb[43].mxu1 }
 0x2fc   : > { %v2754_v15 = vpack.c.bf16 %v1490_v11, %v1488_v35  ;;  %v2786_v5 = vpack.c.bf16 %v1887_v3, %v1885_v8  ;;  %v1494_v25 = vadd.f32 %v1493_v48, %v4371_v10  ;;  %v1891_v47 = vadd.f32 %v1890_v27, %v4374_v2 }
 0x2fe   : > { %2155 = vst [vmem:[%s4385_s25 + $0xa0] sm:$0xff] %v2754_v15  ;;  %2379 = vst [vmem:[%s4388_s20 + $0xa0] sm:$0xff] %v2786_v5  ;;  %v2755_v52 = vpack.c.bf16 %v1494_v25, %v1492_v0  ;;  %v2787_v41 = vpack.c.bf16 %v1891_v47, %v1889_v51 }
 0x300   : > { %2156 = vst [vmem:[%s4385_s25 + $0xa8] sm:$0xff] %v2755_v52  ;;  %2380 = vst [vmem:[%s4388_s20 + $0xa8] sm:$0xff] %v2787_v41 }
 0x340   : > { %v1497_v9 = vpop.f32.mrb[44].mxu0  ;;  %v1894_v22 = vpop.f32.mrb[44].mxu1 }
 0x341   : > { %v1498_v28 = vadd.f32 %v1497_v9, %v4365_v29  ;;  %v1895_v39 = vadd.f32 %v1894_v22, %v4368_v46  ;;  %v1499_v14 = vpop.f32.mrb[45].mxu0  ;;  %v1896_v37 = vpop.f32.mrb[45].mxu1 }
 0x342   : > { %v1500_v57 = vadd.f32 %v1499_v14, %v4371_v10  ;;  %v1897_v50 = vadd.f32 %v1896_v37, %v4374_v2  ;;  %v1501_v18 = vpop.f32.mrb[46].mxu0  ;;  %v1898_v54 = vpop.f32.mrb[46].mxu1 }
 0x343   : > { %v1502_v43 = vadd.f32 %v1501_v18, %v4365_v29  ;;  %v1899_v19 = vadd.f32 %v1898_v54, %v4368_v46  ;;  %v1503_v56 = vpop.f32.mrb[47].mxu0  ;;  %v1900_v34 = vpop.f32.mrb[47].mxu1 }
 0x344   : > { %v2756_v6 = vpack.c.bf16 %v1500_v57, %v1498_v28  ;;  %v2788_v36 = vpack.c.bf16 %v1897_v50, %v1895_v39  ;;  %v1504_v30 = vadd.f32 %v1503_v56, %v4371_v10  ;;  %v1901_v53 = vadd.f32 %v1900_v34, %v4374_v2 }
 0x346   : > { %2157 = vst [vmem:[%s4385_s25 + $0xb0] sm:$0xff] %v2756_v6  ;;  %2381 = vst [vmem:[%s4388_s20 + $0xb0] sm:$0xff] %v2788_v36  ;;  %v2757_v13 = vpack.c.bf16 %v1504_v30, %v1502_v43  ;;  %v2789_v62 = vpack.c.bf16 %v1901_v53, %v1899_v19 }
 0x348   : > { %2158 = vst [vmem:[%s4385_s25 + $0xb8] sm:$0xff] %v2757_v13  ;;  %2382 = vst [vmem:[%s4388_s20 + $0xb8] sm:$0xff] %v2789_v62  ;;  %v1507_v42 = vpop.f32.mrb[48].mxu0  ;;  %v1904_v24 = vpop.f32.mrb[48].mxu1 }
 0x349   : > { %v1508_v16 = vadd.f32 %v1507_v42, %v4365_v29  ;;  %v1905_v17 = vadd.f32 %v1904_v24, %v4368_v46  ;;  %v1509_v59 = vpop.f32.mrb[49].mxu0  ;;  %v1906_v44 = vpop.f32.mrb[49].mxu1 }
 0x34a   : > { %v1510_v61 = vadd.f32 %v1509_v59, %v4371_v10  ;;  %v1907_v49 = vadd.f32 %v1906_v44, %v4374_v2  ;;  %v1511_v26 = vpop.f32.mrb[50].mxu0  ;;  %v1908_v40 = vpop.f32.mrb[50].mxu1 }
 0x34b   : > { %v1512_v45 = vadd.f32 %v1511_v26, %v4365_v29  ;;  %v1909_v63 = vadd.f32 %v1908_v40, %v4368_v46  ;;  %v1513_v33 = vpop.f32.mrb[51].mxu0  ;;  %v1910_v23 = vpop.f32.mrb[51].mxu1 }
 0x34c   : > { %v2758_v7 = vpack.c.bf16 %v1510_v61, %v1508_v16  ;;  %v2790_v32 = vpack.c.bf16 %v1907_v49, %v1905_v17  ;;  %v1514_v38 = vadd.f32 %v1513_v33, %v4371_v10  ;;  %v1911_v60 = vadd.f32 %v1910_v23, %v4374_v2 }
 0x34e   : > { %2159 = vst [vmem:[%s4385_s25 + $0xc0] sm:$0xff] %v2758_v7  ;;  %2383 = vst [vmem:[%s4388_s20 + $0xc0] sm:$0xff] %v2790_v32  ;;  %v2759_v1 = vpack.c.bf16 %v1514_v38, %v1512_v45  ;;  %v2791_v12 = vpack.c.bf16 %v1911_v60, %v1909_v63 }
 0x350   : > { %2160 = vst [vmem:[%s4385_s25 + $0xc8] sm:$0xff] %v2759_v1  ;;  %2384 = vst [vmem:[%s4388_s20 + $0xc8] sm:$0xff] %v2791_v12  ;;  %v1517_v20 = vpop.f32.mrb[52].mxu0  ;;  %v1914_v21 = vpop.f32.mrb[52].mxu1 }
 0x351   : > { %v1518_v35 = vadd.f32 %v1517_v20, %v4365_v29  ;;  %v1915_v8 = vadd.f32 %v1914_v21, %v4368_v46  ;;  %v1519_v31 = vpop.f32.mrb[53].mxu0  ;;  %v1916_v4 = vpop.f32.mrb[53].mxu1 }
 0x352   : > { %v1520_v11 = vadd.f32 %v1519_v31, %v4371_v10  ;;  %v1917_v3 = vadd.f32 %v1916_v4, %v4374_v2  ;;  %v1521_v55 = vpop.f32.mrb[54].mxu0  ;;  %v1918_v58 = vpop.f32.mrb[54].mxu1 }
 0x353   : > { %v1522_v0 = vadd.f32 %v1521_v55, %v4365_v29  ;;  %v1919_v51 = vadd.f32 %v1918_v58, %v4368_v46  ;;  %v1523_v48 = vpop.f32.mrb[55].mxu0  ;;  %v1920_v27 = vpop.f32.mrb[55].mxu1 }
 0x354   : > { %v2760_v15 = vpack.c.bf16 %v1520_v11, %v1518_v35  ;;  %v2792_v5 = vpack.c.bf16 %v1917_v3, %v1915_v8  ;;  %v1524_v25 = vadd.f32 %v1523_v48, %v4371_v10  ;;  %v1921_v47 = vadd.f32 %v1920_v27, %v4374_v2 }
 0x356   : > { %2161 = vst [vmem:[%s4385_s25 + $0xd0] sm:$0xff] %v2760_v15  ;;  %2385 = vst [vmem:[%s4388_s20 + $0xd0] sm:$0xff] %v2792_v5  ;;  %v2761_v52 = vpack.c.bf16 %v1524_v25, %v1522_v0  ;;  %v2793_v41 = vpack.c.bf16 %v1921_v47, %v1919_v51 }
 0x358   : > { %2162 = vst [vmem:[%s4385_s25 + $0xd8] sm:$0xff] %v2761_v52  ;;  %2386 = vst [vmem:[%s4388_s20 + $0xd8] sm:$0xff] %v2793_v41  ;;  %v1527_v9 = vpop.f32.mrb[56].mxu0  ;;  %v1924_v22 = vpop.f32.mrb[56].mxu1 }
 0x359   : > { %v1528_v28 = vadd.f32 %v1527_v9, %v4365_v29  ;;  %v1925_v39 = vadd.f32 %v1924_v22, %v4368_v46  ;;  %v1529_v14 = vpop.f32.mrb[57].mxu0  ;;  %v1926_v37 = vpop.f32.mrb[57].mxu1 }
 0x35a   : > { %v1530_v57 = vadd.f32 %v1529_v14, %v4371_v10  ;;  %v1927_v50 = vadd.f32 %v1926_v37, %v4374_v2  ;;  %v1531_v18 = vpop.f32.mrb[58].mxu0  ;;  %v1928_v54 = vpop.f32.mrb[58].mxu1 }
 0x35b   : > { %v1532_v43 = vadd.f32 %v1531_v18, %v4365_v29  ;;  %v1929_v19 = vadd.f32 %v1928_v54, %v4368_v46  ;;  %v1533_v56 = vpop.f32.mrb[59].mxu0  ;;  %v1930_v34 = vpop.f32.mrb[59].mxu1 }
 0x35c   : > { %v2762_v6 = vpack.c.bf16 %v1530_v57, %v1528_v28  ;;  %v2794_v36 = vpack.c.bf16 %v1927_v50, %v1925_v39  ;;  %v1534_v30 = vadd.f32 %v1533_v56, %v4371_v10  ;;  %v1931_v53 = vadd.f32 %v1930_v34, %v4374_v2 }
 0x35e   : > { %2163 = vst [vmem:[%s4385_s25 + $0xe0] sm:$0xff] %v2762_v6  ;;  %2387 = vst [vmem:[%s4388_s20 + $0xe0] sm:$0xff] %v2794_v36  ;;  %v2763_v13 = vpack.c.bf16 %v1534_v30, %v1532_v43  ;;  %v2795_v62 = vpack.c.bf16 %v1931_v53, %v1929_v19 }
 0x360   : > { %2164 = vst [vmem:[%s4385_s25 + $0xe8] sm:$0xff] %v2763_v13  ;;  %2388 = vst [vmem:[%s4388_s20 + $0xe8] sm:$0xff] %v2795_v62  ;;  %v1537_v42 = vpop.f32.mrb[60].mxu0  ;;  %v1934_v24 = vpop.f32.mrb[60].mxu1 }
 0x361   : > { %v1538_v16 = vadd.f32 %v1537_v42, %v4365_v29  ;;  %v1935_v17 = vadd.f32 %v1934_v24, %v4368_v46  ;;  %v1539_v59 = vpop.f32.mrb[61].mxu0  ;;  %v1936_v44 = vpop.f32.mrb[61].mxu1 }
 0x362   : > { %v1540_v61 = vadd.f32 %v1539_v59, %v4371_v10  ;;  %v1937_v49 = vadd.f32 %v1936_v44, %v4374_v2  ;;  %v1541_v26 = vpop.f32.mrb[62].mxu0  ;;  %v1938_v40 = vpop.f32.mrb[62].mxu1 }
 0x363   : > { %v1542_v45 = vadd.f32 %v1541_v26, %v4365_v29  ;;  %v1939_v63 = vadd.f32 %v1938_v40, %v4368_v46  ;;  %v1543_v33 = vpop.f32.mrb[63].mxu0  ;;  %v1940_v23 = vpop.f32.mrb[63].mxu1 }
 0x364   : > { %v2764_v7 = vpack.c.bf16 %v1540_v61, %v1538_v16  ;;  %v2796_v32 = vpack.c.bf16 %v1937_v49, %v1935_v17  ;;  %v1544_v38 = vadd.f32 %v1543_v33, %v4371_v10  ;;  %v1941_v60 = vadd.f32 %v1940_v23, %v4374_v2 }
 0x366   : > { %2165 = vst [vmem:[%s4385_s25 + $0xf0] sm:$0xff] %v2764_v7  ;;  %2389 = vst [vmem:[%s4388_s20 + $0xf0] sm:$0xff] %v2796_v32  ;;  %v2765_v29 = vpack.c.bf16 %v1544_v38, %v1542_v45  ;;  %v2797_v46 = vpack.c.bf16 %v1941_v60, %v1939_v63 }
 0x368   : > { %2166 = vst [vmem:[%s4385_s25 + $0xf8] sm:$0xff] %v2765_v29  ;;  %2390 = vst [vmem:[%s4388_s20 + $0xf8] sm:$0xff] %v2797_v46 }
 0x369   : > { %3169 = shalt.err (!%p3166_p7)
}
 0x36a   : > { %s3170_s25 = scalar_lea.hbm %s4581_s18, 4096  ;;  %s3174_s19 = scalar_lea.hbm %s4819_s16, 16384 }
 0x36b   : > { %p3171_p12 = scmp.ne.s32.totalorder %s4581_s18, %s3170_s25  ;;  %p3175_p5 = scmp.lt.u32.totalorder %s4581_s18, %s4819_s16 }
 0x36c   : > { %p3176_p9 = scmp.lt.u32.totalorder %s3174_s19, %s3170_s25  ;;  %p3178_p2 = scmp.lt.u32.totalorder %s3170_s25, %s4581_s18 }
 0x36d   : > { %p3172_p11 = pnand %p3171_p12, %p3490_p6 }
 0x36e   : > { %p3177_p0 = por %p3176_p9, %p3175_p5 }
 0x36f   : > { %p3173_p1 = pneg %p3172_p11 }
 0x370   : > { %p3179_p10 = por %p3178_p2, %p3177_p0 }
 0x372   : > { %p3180_p4 = pnand %p3179_p10, %p3173_p1 }
 0x374   : > { %3183 = shalt.err (!%p3180_p4)
}
 0x375   : > { %s3300_s7 = smov 128   ;;  %s3301_s8 = smov 8  }
 0x376   : > { %2810 = dma.vmem_to_hbm [thread:$0]  (%p3490_p6), %s4575_s9, 4096, %s4581_s18, %s2392_s21, %s3300_s7, %s3300_s7, %s3301_s8  }
 0x377   : > { %s2397_s5 = scalar_lea.sflag [#allocation10], %s3551_s26  ;;  %s3184_s17 = scalar_lea.vmem %s4590_s15, 4096 }
 0x378   : > { %p3185_p8 = scmp.ne.s32.totalorder %s4590_s15, %s3184_s17  ;;  %s3302_s25 = smov [#allocation9]  }
 0x379   : > { %s3188_s20 = sshll.u32 %s3302_s25, 4  ;;  %s3189_s20 = int_to_ptr.vmem [resolvable:$false] %s3188_s20 }
 0x37a   : > { %p3186_p13 = pnand %p3185_p8, %p3490_p6  ;;  %s3190_s13 = scalar_lea.vmem %s3189_s20, 8192 }
 0x37b   : > { %p3191_p7 = scmp.lt.s32.totalorder %s4590_s15, %s3189_s20  ;;  %p3192_p12 = scmp.lt.s32.totalorder %s3190_s13, %s3184_s17 }
 0x37c   : > { %p3187_p3 = pneg %p3186_p13 }
 0x37d   : > { %p3193_p11 = por %p3192_p12, %p3191_p7 }
 0x37f   : > { %p3194_p1 = pnand %p3193_p11, %p3187_p3 }
 0x381   : > { %3197 = shalt.err (!%p3194_p1)
}
 0x382   : > { %s3198_s9 = scalar_lea.hbm %s4588_s23, 4096  ;;  %s3202_s19 = scalar_lea.hbm %s4820_s14, 16384 }
 0x383   : > { %p3199_p5 = scmp.ne.s32.totalorder %s4588_s23, %s3198_s9  ;;  %p3203_p2 = scmp.lt.u32.totalorder %s4588_s23, %s4820_s14 }
 0x384   : > { %p3204_p10 = scmp.lt.u32.totalorder %s3202_s19, %s3198_s9  ;;  %p3206_p8 = scmp.lt.u32.totalorder %s3198_s9, %s4588_s23 }
 0x385   : > { %p3200_p9 = pnand %p3199_p5, %p3490_p6 }
 0x386   : > { %p3205_p4 = por %p3204_p10, %p3203_p2 }
 0x387   : > { %p3201_p0 = pneg %p3200_p9 }
 0x388   : > { %p3207_p13 = por %p3206_p8, %p3205_p4 }
 0x38a   : > { %p3208_p3 = pnand %p3207_p13, %p3201_p0 }
 0x38c   : > { %3211 = shalt.err (!%p3208_p3)
}
 0x38d   : > { %2811 = dma.vmem_to_hbm [thread:$0]  (%p3490_p6), %s4590_s15, 4096, %s4588_s23, %s2397_s5, %s3300_s7, %s3300_s7, %s3301_s8  }
 0x38e PF: > { %s4821_s17 = sld [smem:[#allocation15_spill]]  ;;  %s4822_s25 = sld [smem:[#allocation18_spill]] }
 0x38f   : > { %p2837_p7 = scmp.ge.s32.totalorder %s3290_s12, 2 }
 0x394   : > { %s2447_s20 = sand.u32 1, %s4821_s17   ;;  %p4823_p12 = scmp.ne.s32.totalorder %s4822_s25, 0 }
 0x395   : > { %s2448_s13 = scalar_lea.sflag [#allocation4], %s2447_s20 }
 0x396   : > { %p2826_p11 = pnand %p2837_p7, %p4823_p12 }
 0x398   : > { %3253 = dma.done.wait (!%p2826_p11), %s2448_s13, 4096  }
 0x399   : > { %3255 = vsyncadd (!%p2826_p11), %s2448_s13, 4294963200  ;;  %s2457_s30 = scalar_lea.sflag [#allocation10], %s2447_s20 }
 0x39a   : > { %3257 = dma.done.wait (!%p2826_p11), %s2457_s30, 4096  }
 0x39b   : > { %3259 = vsyncadd (!%p2826_p11), %s2457_s30, 4294963200  ;;  %s29_s12 = sadd.s32 1, %s3290_s12   ;;  %s4824_s26 = sld [smem:[#allocation19_spill]] }
 0x39c   : > { %p26_p1 = scmp.ge.s32.totalorder %s29_s12, 6   ;;  %s4825_s15 = smov %s4838_s27 }
 0x39d   : > { %s4826_s27 = smov %s3266_s28  ;;  %s4827_s28 = smov %s3270_s29 }
 0x39e   : > { %s4828_s29 = smov %s3503_s3  ;;  %s4829_s30 = smov %s3282_s10 }
 0x39f   : > { %s4830_s9 = smov %s3286_s11  ;;  %s4832_s11 = smov %s4825_s15 }
 0x3a0   :  { %28 = sbr.rel (!%p26_p1) target bundleno = 15 (0xf), region = 118 }
 0x3a1   : > { %s4831_s10 = smov %s4824_s26 }
 0x3a7   :  { %2462 = vsyncpa [#allocation3], 1 }
 0x3a8   :  { %2464 = vsyncpa [#allocation3 + $0x1], 1 }
 0x3a9   :  { %2465 = vsyncpa [#allocation6], 1 }
 0x3aa   :  { %2466 = vsyncpa [#allocation4], 1 }
 0x3ab   :  { %2468 = vsyncpa [#allocation4 + $0x1], 1 }
 0x3ac   :  { %2469 = vsyncpa [#allocation10], 1 }
 0x3ad   :  { %2471 = vsyncpa [#allocation10 + $0x1], 1 }

</bundles_post_ra>
